<compile_context>
chip_gen: v6e
topology: v6e:2x2x1
jax: 0.10.0
libtpu: 0.0.40
codegen_flags: <defaults>
</compile_context>

<pallas_src>
import numpy as np
import jax
import jax.numpy as jnp
from jax.experimental import pallas as pl
from jax.experimental.pallas import tpu as pltpu


def _sigmoid(z):
    # tanh-form sigmoid: single transcendental on the EUP, no divide.
    return 0.5 * (jnp.tanh(0.5 * z) + 1.0)


def bati_kernel(x_ref, l1_ref, l2_ref, lin_ref, out_ref):
    I, N, F = x_ref.shape
    H4 = l1_ref.shape[1]          # 4 * hidden
    H = H4 // 4

    # ---- unpack parameter slabs (one-time, outside the recurrent loop) ----
    l1 = l1_ref[...]
    whh1 = l1[0:H, :]             # (H, 4H)  recurrent weights, gates stacked on lanes
    wih1 = l1[H:H + 1, :]         # (1, 4H)  input weights (input width = 1)
    b1 = l1[H + 1:H + 2, :]       # (1, 4H)  b_ih + b_hh

    l2 = l2_ref[...]
    wih2 = l2[0:H, :]             # (H, 4)
    whh2 = l2[H:H + 1, :]         # (1, 4)
    b2 = l2[H + 1:H + 2, :]       # (1, 4)

    lin = lin_ref[...]
    wlin = lin[0:1, :].reshape(1, 1, F)   # Linear(F,1) weight as a row
    blin = lin[1:2, 0:1]                  # (1, 1)
    wadj = lin[1:2, 1:2]                  # (1, 1)  Linear(1,1) weight
    badj = lin[1:2, 2:3]                  # (1, 1)  Linear(1,1) bias

    # ---- hoisted input projection + ReLU for all steps ----
    x_all = x_ref[...]                                             # (I, N, F)
    out_l = jnp.sum(x_all * wlin, axis=-1, keepdims=True)          # (I, N, 1)
    out_l = jnp.maximum(out_l + blin.reshape(1, 1, 1), 0.0)

    # LSTM1 input-gate contribution for all steps (+ bias folded in):
    # input width is 1, so x @ W_ih is a rank-1 broadcast multiply on the VPU.
    ih1_all = out_l * wih1.reshape(1, 1, H4) + b1.reshape(1, 1, H4)  # (I, N, 4H)

    # ---- recurrence (small static sequence -> static unroll) ----
    h1 = jnp.zeros((N, H), jnp.float32)
    c1 = jnp.zeros((N, H), jnp.float32)
    h2 = jnp.zeros((N, 1), jnp.float32)
    c2 = jnp.zeros((N, 1), jnp.float32)

    lane = jax.lax.broadcasted_iota(jnp.int32, (N, I), 1)  # output column index
    acc = jnp.zeros((N, I), jnp.float32)

    for i in range(I):
        # LSTMCell(1 -> H): only the recurrent matmul is on the serial path.
        g1 = ih1_all[i] + jnp.dot(h1, whh1, preferred_element_type=jnp.float32)  # (N, 4H)
        i1 = _sigmoid(g1[:, 0:H])
        f1 = _sigmoid(g1[:, H:2 * H])
        gg1 = jnp.tanh(g1[:, 2 * H:3 * H])
        o1 = _sigmoid(g1[:, 3 * H:4 * H])
        c1 = f1 * c1 + i1 * gg1
        h1 = o1 * jnp.tanh(c1)

        # LSTMCell(H -> 1): recurrent part (width 1) is a broadcast multiply.
        g2 = (jnp.dot(h1, wih2, preferred_element_type=jnp.float32)
              + h2 * whh2 + b2)                                                   # (N, 4)
        i2 = _sigmoid(g2[:, 0:1])
        f2 = _sigmoid(g2[:, 1:2])
        gg2 = jnp.tanh(g2[:, 2:3])
        o2 = _sigmoid(g2[:, 3:4])
        c2 = f2 * c2 + i2 * gg2
        h2 = o2 * jnp.tanh(c2)

        # Place this step's h2 at output column i (lane select; no masked store).
        acc = acc + jnp.where(lane == i, h2, 0.0)

    # ---- adjust layer (Linear(1,1) == scalar scale + bias), single dense store ----
    out_ref[...] = acc * wadj + badj


def pack_params(p, hidden):
    """Pack the 11 raw (PyTorch-layout) params into 3 lane-dense slabs."""
    H = hidden
    slab1 = jnp.concatenate([
        p['w_hh1'].T,                                    # (H, 4H)
        p['w_ih1'].T,                                    # (1, 4H)
        (p['b_ih1'] + p['b_hh1']).reshape(1, 4 * H),     # (1, 4H)
    ], axis=0).astype(jnp.float32)                       # (H+2, 4H)
    slab2 = jnp.concatenate([
        p['w_ih2'].T,                                    # (H, 4)
        p['w_hh2'].T,                                    # (1, 4)
        (p['b_ih2'] + p['b_hh2']).reshape(1, 4),         # (1, 4)
    ], axis=0).astype(jnp.float32)                       # (H+2, 4)
    F = p['w_lin'].shape[1]
    scal = jnp.zeros((1, F), jnp.float32)
    scal = scal.at[0, 0].set(p['b_lin'][0])
    scal = scal.at[0, 1].set(p['w_adj'][0, 0])
    scal = scal.at[0, 2].set(p['b_adj'][0])
    slab3 = jnp.concatenate([p['w_lin'].astype(jnp.float32), scal], axis=0)  # (2, F)
    return slab1, slab2, slab3


def bati_forward(x_nihw, packed):
    """x_nihw: (N, I, W, H) float32 -> (N, I) float32."""
    N, I, W, Hh = x_nihw.shape
    F = W * Hh
    x = jnp.transpose(x_nihw.reshape(N, I, F).astype(jnp.float32), (1, 0, 2))  # (I, N, F)
    slab1, slab2, slab3 = packed

    vmem = pl.BlockSpec(memory_space=pltpu.MemorySpace.VMEM)
    return pl.pallas_call(
        bati_kernel,
        out_shape=jax.ShapeDtypeStruct((N, I), jnp.float32),
        in_specs=[vmem, vmem, vmem, vmem],
        out_specs=vmem,
    )(x, slab1, slab2, slab3)


def init_params(key, hidden=51, lw=7, lh=7):
    """Deterministic synthetic parameters in PyTorch layouts."""
    F = lw * lh
    ks = jax.random.split(key, 12)

    def u(k, shape, fan_in):
        bound = 1.0 / np.sqrt(fan_in)
        return jax.random.uniform(k, shape, jnp.float32, -bound, bound)

    return dict(
        # nn.Linear(F, 1)
        w_lin=u(ks[0], (1, F), F), b_lin=u(ks[1], (1,), F),
        # nn.LSTMCell(1, H)
        w_ih1=u(ks[2], (4 * hidden, 1), hidden), w_hh1=u(ks[3], (4 * hidden, hidden), hidden),
        b_ih1=u(ks[4], (4 * hidden,), hidden), b_hh1=u(ks[5], (4 * hidden,), hidden),
        # nn.LSTMCell(H, 1)
        w_ih2=u(ks[6], (4, hidden), 1), w_hh2=u(ks[7], (4, 1), 1),
        b_ih2=u(ks[8], (4,), 1), b_hh2=u(ks[9], (4,), 1),
        # nn.Linear(1, 1)
        w_adj=u(ks[10], (1, 1), 1), b_adj=u(ks[11], (1,), 1),
    )


def bati_ref(x_nihw, p):
    """Pure-JAX reference mirroring the PyTorch forward (for verification)."""
    N, I, W, Hh = x_nihw.shape
    F = W * Hh
    x = x_nihw.reshape(N, I, F).astype(jnp.float32)
    H = p['w_hh1'].shape[1]
    h1 = jnp.zeros((N, H), jnp.float32)
    c1 = jnp.zeros((N, H), jnp.float32)
    h2 = jnp.zeros((N, 1), jnp.float32)
    c2 = jnp.zeros((N, 1), jnp.float32)

    def cell(xv, h, c, w_ih, w_hh, b_ih, b_hh):
        z = xv @ w_ih.T + h @ w_hh.T + b_ih + b_hh
        Hc = h.shape[1]
        i_g = jax.nn.sigmoid(z[:, 0:Hc])
        f_g = jax.nn.sigmoid(z[:, Hc:2 * Hc])
        g_g = jnp.tanh(z[:, 2 * Hc:3 * Hc])
        o_g = jax.nn.sigmoid(z[:, 3 * Hc:4 * Hc])
        c_new = f_g * c + i_g * g_g
        return o_g * jnp.tanh(c_new), c_new

    outs = []
    for i in range(I):
        out_l = jax.nn.relu(x[:, i, :] @ p['w_lin'].T + p['b_lin'])
        h1, c1 = cell(out_l, h1, c1, p['w_ih1'], p['w_hh1'], p['b_ih1'], p['b_hh1'])
        h2, c2 = cell(h1, h2, c2, p['w_ih2'], p['w_hh2'], p['b_ih2'], p['b_hh2'])
        outs.append(h2 @ p['w_adj'].T + p['b_adj'])
    return jnp.concatenate(outs, axis=1)


if __name__ == "__main__":
    key = jax.random.PRNGKey(0)
    k_param, k_x = jax.random.split(key)

    N, I, LW, LH, HIDDEN = 2, 8, 7, 7, 51     # batch=2, seq=8, 7x7 image, hidden=51
    params = init_params(k_param, hidden=HIDDEN, lw=LW, lh=LH)
    packed = pack_params(params, HIDDEN)
    x = jax.random.normal(k_x, (N, I, LW, LH), jnp.float32)

    out = jax.block_until_ready(bati_forward(x, packed))
    ref = jax.block_until_ready(bati_ref(x, params))

    assert out.shape == (N, I)
    if not np.allclose(np.asarray(out), np.asarray(ref), atol=1e-4, rtol=1e-4):
        raise AssertionError("Pallas kernel does not match pure-JAX reference")

    print("KERNEL_OK")
</pallas_src>

<mosaic_0001>
module attributes {stable_mosaic.version = 11 : i64} {
  func.func @bati_kernel(%arg0: memref<8x2x49xf32, #tpu.memory_space<vmem>>, %arg1: memref<53x204xf32, #tpu.memory_space<vmem>>, %arg2: memref<53x4xf32, #tpu.memory_space<vmem>>, %arg3: memref<2x49xf32, #tpu.memory_space<vmem>>, %arg4: memref<2x8xf32, #tpu.memory_space<vmem>>) attributes {dimension_semantics = [], scalar_prefetch = 0 : i64, scratch_operands = 0 : i64, tpu.core_type = #tpu.core_type<tc>} {
    %c0 = arith.constant 0 : index
    %c0_0 = arith.constant 0 : index
    %0 = vector.load %arg1[%c0, %c0_0] : memref<53x204xf32, #tpu.memory_space<vmem>>, vector<53x204xf32>
    %1 = vector.extract_strided_slice %0 {offsets = [0, 0], sizes = [51, 204], strides = [1, 1]} : vector<53x204xf32> to vector<51x204xf32>
    %2 = vector.extract_strided_slice %0 {offsets = [51, 0], sizes = [1, 204], strides = [1, 1]} : vector<53x204xf32> to vector<1x204xf32>
    %3 = vector.extract_strided_slice %0 {offsets = [52, 0], sizes = [1, 204], strides = [1, 1]} : vector<53x204xf32> to vector<1x204xf32>
    %c0_1 = arith.constant 0 : index
    %c0_2 = arith.constant 0 : index
    %4 = vector.load %arg2[%c0_1, %c0_2] : memref<53x4xf32, #tpu.memory_space<vmem>>, vector<53x4xf32>
    %5 = vector.extract_strided_slice %4 {offsets = [0, 0], sizes = [51, 4], strides = [1, 1]} : vector<53x4xf32> to vector<51x4xf32>
    %6 = vector.extract_strided_slice %4 {offsets = [51, 0], sizes = [1, 4], strides = [1, 1]} : vector<53x4xf32> to vector<1x4xf32>
    %7 = vector.extract_strided_slice %4 {offsets = [52, 0], sizes = [1, 4], strides = [1, 1]} : vector<53x4xf32> to vector<1x4xf32>
    %c0_3 = arith.constant 0 : index
    %c0_4 = arith.constant 0 : index
    %8 = vector.load %arg3[%c0_3, %c0_4] : memref<2x49xf32, #tpu.memory_space<vmem>>, vector<2x49xf32>
    %9 = vector.extract_strided_slice %8 {offsets = [0, 0], sizes = [1, 49], strides = [1, 1]} : vector<2x49xf32> to vector<1x49xf32>
    %10 = vector.shape_cast %9 : vector<1x49xf32> to vector<1x1x49xf32>
    %11 = vector.extract_strided_slice %8 {offsets = [1, 0], sizes = [1, 1], strides = [1, 1]} : vector<2x49xf32> to vector<1x1xf32>
    %12 = vector.extract_strided_slice %8 {offsets = [1, 1], sizes = [1, 1], strides = [1, 1]} : vector<2x49xf32> to vector<1x1xf32>
    %13 = vector.extract_strided_slice %8 {offsets = [1, 2], sizes = [1, 1], strides = [1, 1]} : vector<2x49xf32> to vector<1x1xf32>
    %c0_5 = arith.constant 0 : index
    %c0_6 = arith.constant 0 : index
    %c0_7 = arith.constant 0 : index
    %14 = vector.load %arg0[%c0_5, %c0_6, %c0_7] : memref<8x2x49xf32, #tpu.memory_space<vmem>>, vector<8x2x49xf32>
    %15 = vector.broadcast %10 : vector<1x1x49xf32> to vector<8x2x49xf32>
    %16 = arith.mulf %14, %15 : vector<8x2x49xf32>
    %cst = arith.constant dense<0.000000e+00> : vector<8x2xf32>
    %17 = vector.multi_reduction <add>, %16, %cst [2] : vector<8x2x49xf32> to vector<8x2xf32>
    %18 = vector.shape_cast %17 : vector<8x2xf32> to vector<8x2x1xf32>
    %19 = vector.shape_cast %11 : vector<1x1xf32> to vector<1x1x1xf32>
    %20 = vector.broadcast %19 : vector<1x1x1xf32> to vector<8x2x1xf32>
    %21 = arith.addf %18, %20 : vector<8x2x1xf32>
    %cst_8 = arith.constant 0.000000e+00 : f32
    %22 = vector.broadcast %cst_8 : f32 to vector<8x2x1xf32>
    %23 = arith.maximumf %21, %22 : vector<8x2x1xf32>
    %24 = vector.shape_cast %2 : vector<1x204xf32> to vector<1x1x204xf32>
    %25 = vector.broadcast %23 : vector<8x2x1xf32> to vector<8x2x204xf32>
    %26 = vector.broadcast %24 : vector<1x1x204xf32> to vector<8x2x204xf32>
    %27 = arith.mulf %25, %26 : vector<8x2x204xf32>
    %28 = vector.shape_cast %3 : vector<1x204xf32> to vector<1x1x204xf32>
    %29 = vector.broadcast %28 : vector<1x1x204xf32> to vector<8x2x204xf32>
    %30 = arith.addf %27, %29 : vector<8x2x204xf32>
    %cst_9 = arith.constant 0.000000e+00 : f32
    %31 = vector.broadcast %cst_9 : f32 to vector<2x51xf32>
    %cst_10 = arith.constant 0.000000e+00 : f32
    %32 = vector.broadcast %cst_10 : f32 to vector<2x51xf32>
    %cst_11 = arith.constant 0.000000e+00 : f32
    %33 = vector.broadcast %cst_11 : f32 to vector<2x1xf32>
    %cst_12 = arith.constant 0.000000e+00 : f32
    %34 = vector.broadcast %cst_12 : f32 to vector<2x1xf32>
    %35 = tpu.iota {dimensions = array<i32: 1>} : vector<2x8xi32>
    %cst_13 = arith.constant 0.000000e+00 : f32
    %36 = vector.broadcast %cst_13 : f32 to vector<2x8xf32>
    %37 = vector.extract_strided_slice %30 {offsets = [0, 0, 0], sizes = [1, 2, 204], strides = [1, 1, 1]} : vector<8x2x204xf32> to vector<1x2x204xf32>
    %38 = vector.shape_cast %37 : vector<1x2x204xf32> to vector<2x204xf32>
    %cst_14 = arith.constant dense<0.000000e+00> : vector<2x204xf32>
    %39 = tpu.matmul %31, %1, %cst_14 {dimension_numbers = #tpu.dot_dimension_numbers<[1], [0], [0], [1], [0, 0, 1, 1], [], []>} : vector<2x51xf32>, vector<51x204xf32>, vector<2x204xf32> -> vector<2x204xf32>
    %40 = arith.addf %38, %39 : vector<2x204xf32>
    %41 = vector.extract_strided_slice %40 {offsets = [0, 0], sizes = [2, 51], strides = [1, 1]} : vector<2x204xf32> to vector<2x51xf32>
    %cst_15 = arith.constant 5.000000e-01 : f32
    %42 = vector.broadcast %cst_15 : f32 to vector<2x51xf32>
    %43 = arith.mulf %42, %41 : vector<2x51xf32>
    %44 = math.tanh %43 : vector<2x51xf32>
    %cst_16 = arith.constant 1.000000e+00 : f32
    %45 = vector.broadcast %cst_16 : f32 to vector<2x51xf32>
    %46 = arith.addf %44, %45 : vector<2x51xf32>
    %cst_17 = arith.constant 5.000000e-01 : f32
    %47 = vector.broadcast %cst_17 : f32 to vector<2x51xf32>
    %48 = arith.mulf %47, %46 : vector<2x51xf32>
    %49 = vector.extract_strided_slice %40 {offsets = [0, 51], sizes = [2, 51], strides = [1, 1]} : vector<2x204xf32> to vector<2x51xf32>
    %cst_18 = arith.constant 5.000000e-01 : f32
    %50 = vector.broadcast %cst_18 : f32 to vector<2x51xf32>
    %51 = arith.mulf %50, %49 : vector<2x51xf32>
    %52 = math.tanh %51 : vector<2x51xf32>
    %cst_19 = arith.constant 1.000000e+00 : f32
    %53 = vector.broadcast %cst_19 : f32 to vector<2x51xf32>
    %54 = arith.addf %52, %53 : vector<2x51xf32>
    %cst_20 = arith.constant 5.000000e-01 : f32
    %55 = vector.broadcast %cst_20 : f32 to vector<2x51xf32>
    %56 = arith.mulf %55, %54 : vector<2x51xf32>
    %57 = vector.extract_strided_slice %40 {offsets = [0, 102], sizes = [2, 51], strides = [1, 1]} : vector<2x204xf32> to vector<2x51xf32>
    %58 = math.tanh %57 : vector<2x51xf32>
    %59 = vector.extract_strided_slice %40 {offsets = [0, 153], sizes = [2, 51], strides = [1, 1]} : vector<2x204xf32> to vector<2x51xf32>
    %cst_21 = arith.constant 5.000000e-01 : f32
    %60 = vector.broadcast %cst_21 : f32 to vector<2x51xf32>
    %61 = arith.mulf %60, %59 : vector<2x51xf32>
    %62 = math.tanh %61 : vector<2x51xf32>
    %cst_22 = arith.constant 1.000000e+00 : f32
    %63 = vector.broadcast %cst_22 : f32 to vector<2x51xf32>
    %64 = arith.addf %62, %63 : vector<2x51xf32>
    %cst_23 = arith.constant 5.000000e-01 : f32
    %65 = vector.broadcast %cst_23 : f32 to vector<2x51xf32>
    %66 = arith.mulf %65, %64 : vector<2x51xf32>
    %67 = arith.mulf %56, %32 : vector<2x51xf32>
    %68 = arith.mulf %48, %58 : vector<2x51xf32>
    %69 = arith.addf %67, %68 : vector<2x51xf32>
    %70 = math.tanh %69 : vector<2x51xf32>
    %71 = arith.mulf %66, %70 : vector<2x51xf32>
    %cst_24 = arith.constant dense<0.000000e+00> : vector<2x4xf32>
    %72 = tpu.matmul %71, %5, %cst_24 {dimension_numbers = #tpu.dot_dimension_numbers<[1], [0], [0], [1], [0, 0, 1, 1], [], []>} : vector<2x51xf32>, vector<51x4xf32>, vector<2x4xf32> -> vector<2x4xf32>
    %73 = vector.broadcast %33 : vector<2x1xf32> to vector<2x4xf32>
    %74 = vector.broadcast %6 : vector<1x4xf32> to vector<2x4xf32>
    %75 = arith.mulf %73, %74 : vector<2x4xf32>
    %76 = arith.addf %72, %75 : vector<2x4xf32>
    %77 = vector.broadcast %7 : vector<1x4xf32> to vector<2x4xf32>
    %78 = arith.addf %76, %77 : vector<2x4xf32>
    %79 = vector.extract_strided_slice %78 {offsets = [0, 0], sizes = [2, 1], strides = [1, 1]} : vector<2x4xf32> to vector<2x1xf32>
    %cst_25 = arith.constant 5.000000e-01 : f32
    %80 = vector.broadcast %cst_25 : f32 to vector<2x1xf32>
    %81 = arith.mulf %80, %79 : vector<2x1xf32>
    %82 = math.tanh %81 : vector<2x1xf32>
    %cst_26 = arith.constant 1.000000e+00 : f32
    %83 = vector.broadcast %cst_26 : f32 to vector<2x1xf32>
    %84 = arith.addf %82, %83 : vector<2x1xf32>
    %cst_27 = arith.constant 5.000000e-01 : f32
    %85 = vector.broadcast %cst_27 : f32 to vector<2x1xf32>
    %86 = arith.mulf %85, %84 : vector<2x1xf32>
    %87 = vector.extract_strided_slice %78 {offsets = [0, 1], sizes = [2, 1], strides = [1, 1]} : vector<2x4xf32> to vector<2x1xf32>
    %cst_28 = arith.constant 5.000000e-01 : f32
    %88 = vector.broadcast %cst_28 : f32 to vector<2x1xf32>
    %89 = arith.mulf %88, %87 : vector<2x1xf32>
    %90 = math.tanh %89 : vector<2x1xf32>
    %cst_29 = arith.constant 1.000000e+00 : f32
    %91 = vector.broadcast %cst_29 : f32 to vector<2x1xf32>
    %92 = arith.addf %90, %91 : vector<2x1xf32>
    %cst_30 = arith.constant 5.000000e-01 : f32
    %93 = vector.broadcast %cst_30 : f32 to vector<2x1xf32>
    %94 = arith.mulf %93, %92 : vector<2x1xf32>
    %95 = vector.extract_strided_slice %78 {offsets = [0, 2], sizes = [2, 1], strides = [1, 1]} : vector<2x4xf32> to vector<2x1xf32>
    %96 = math.tanh %95 : vector<2x1xf32>
    %97 = vector.extract_strided_slice %78 {offsets = [0, 3], sizes = [2, 1], strides = [1, 1]} : vector<2x4xf32> to vector<2x1xf32>
    %cst_31 = arith.constant 5.000000e-01 : f32
    %98 = vector.broadcast %cst_31 : f32 to vector<2x1xf32>
    %99 = arith.mulf %98, %97 : vector<2x1xf32>
    %100 = math.tanh %99 : vector<2x1xf32>
    %cst_32 = arith.constant 1.000000e+00 : f32
    %101 = vector.broadcast %cst_32 : f32 to vector<2x1xf32>
    %102 = arith.addf %100, %101 : vector<2x1xf32>
    %cst_33 = arith.constant 5.000000e-01 : f32
    %103 = vector.broadcast %cst_33 : f32 to vector<2x1xf32>
    %104 = arith.mulf %103, %102 : vector<2x1xf32>
    %105 = arith.mulf %94, %34 : vector<2x1xf32>
    %106 = arith.mulf %86, %96 : vector<2x1xf32>
    %107 = arith.addf %105, %106 : vector<2x1xf32>
    %108 = math.tanh %107 : vector<2x1xf32>
    %109 = arith.mulf %104, %108 : vector<2x1xf32>
    %c0_i32 = arith.constant 0 : i32
    %110 = vector.broadcast %c0_i32 : i32 to vector<2x8xi32>
    %111 = arith.cmpi eq, %35, %110 : vector<2x8xi32>
    %cst_34 = arith.constant 0.000000e+00 : f32
    %112 = vector.shape_cast %109 : vector<2x1xf32> to vector<2x1xf32>
    %113 = vector.broadcast %112 : vector<2x1xf32> to vector<2x8xf32>
    %114 = vector.broadcast %cst_34 : f32 to vector<2x8xf32>
    %115 = arith.select %111, %113, %114 : vector<2x8xi1>, vector<2x8xf32>
    %116 = arith.addf %36, %115 : vector<2x8xf32>
    %117 = vector.extract_strided_slice %30 {offsets = [1, 0, 0], sizes = [1, 2, 204], strides = [1, 1, 1]} : vector<8x2x204xf32> to vector<1x2x204xf32>
    %118 = vector.shape_cast %117 : vector<1x2x204xf32> to vector<2x204xf32>
    %cst_35 = arith.constant dense<0.000000e+00> : vector<2x204xf32>
    %119 = tpu.matmul %71, %1, %cst_35 {dimension_numbers = #tpu.dot_dimension_numbers<[1], [0], [0], [1], [0, 0, 1, 1], [], []>} : vector<2x51xf32>, vector<51x204xf32>, vector<2x204xf32> -> vector<2x204xf32>
    %120 = arith.addf %118, %119 : vector<2x204xf32>
    %121 = vector.extract_strided_slice %120 {offsets = [0, 0], sizes = [2, 51], strides = [1, 1]} : vector<2x204xf32> to vector<2x51xf32>
    %cst_36 = arith.constant 5.000000e-01 : f32
    %122 = vector.broadcast %cst_36 : f32 to vector<2x51xf32>
    %123 = arith.mulf %122, %121 : vector<2x51xf32>
    %124 = math.tanh %123 : vector<2x51xf32>
    %cst_37 = arith.constant 1.000000e+00 : f32
    %125 = vector.broadcast %cst_37 : f32 to vector<2x51xf32>
    %126 = arith.addf %124, %125 : vector<2x51xf32>
    %cst_38 = arith.constant 5.000000e-01 : f32
    %127 = vector.broadcast %cst_38 : f32 to vector<2x51xf32>
    %128 = arith.mulf %127, %126 : vector<2x51xf32>
    %129 = vector.extract_strided_slice %120 {offsets = [0, 51], sizes = [2, 51], strides = [1, 1]} : vector<2x204xf32> to vector<2x51xf32>
    %cst_39 = arith.constant 5.000000e-01 : f32
    %130 = vector.broadcast %cst_39 : f32 to vector<2x51xf32>
    %131 = arith.mulf %130, %129 : vector<2x51xf32>
    %132 = math.tanh %131 : vector<2x51xf32>
    %cst_40 = arith.constant 1.000000e+00 : f32
    %133 = vector.broadcast %cst_40 : f32 to vector<2x51xf32>
    %134 = arith.addf %132, %133 : vector<2x51xf32>
    %cst_41 = arith.constant 5.000000e-01 : f32
    %135 = vector.broadcast %cst_41 : f32 to vector<2x51xf32>
    %136 = arith.mulf %135, %134 : vector<2x51xf32>
    %137 = vector.extract_strided_slice %120 {offsets = [0, 102], sizes = [2, 51], strides = [1, 1]} : vector<2x204xf32> to vector<2x51xf32>
    %138 = math.tanh %137 : vector<2x51xf32>
    %139 = vector.extract_strided_slice %120 {offsets = [0, 153], sizes = [2, 51], strides = [1, 1]} : vector<2x204xf32> to vector<2x51xf32>
    %cst_42 = arith.constant 5.000000e-01 : f32
    %140 = vector.broadcast %cst_42 : f32 to vector<2x51xf32>
    %141 = arith.mulf %140, %139 : vector<2x51xf32>
    %142 = math.tanh %141 : vector<2x51xf32>
    %cst_43 = arith.constant 1.000000e+00 : f32
    %143 = vector.broadcast %cst_43 : f32 to vector<2x51xf32>
    %144 = arith.addf %142, %143 : vector<2x51xf32>
    %cst_44 = arith.constant 5.000000e-01 : f32
    %145 = vector.broadcast %cst_44 : f32 to vector<2x51xf32>
    %146 = arith.mulf %145, %144 : vector<2x51xf32>
    %147 = arith.mulf %136, %69 : vector<2x51xf32>
    %148 = arith.mulf %128, %138 : vector<2x51xf32>
    %149 = arith.addf %147, %148 : vector<2x51xf32>
    %150 = math.tanh %149 : vector<2x51xf32>
    %151 = arith.mulf %146, %150 : vector<2x51xf32>
    %cst_45 = arith.constant dense<0.000000e+00> : vector<2x4xf32>
    %152 = tpu.matmul %151, %5, %cst_45 {dimension_numbers = #tpu.dot_dimension_numbers<[1], [0], [0], [1], [0, 0, 1, 1], [], []>} : vector<2x51xf32>, vector<51x4xf32>, vector<2x4xf32> -> vector<2x4xf32>
    %153 = vector.broadcast %109 : vector<2x1xf32> to vector<2x4xf32>
    %154 = vector.broadcast %6 : vector<1x4xf32> to vector<2x4xf32>
    %155 = arith.mulf %153, %154 : vector<2x4xf32>
    %156 = arith.addf %152, %155 : vector<2x4xf32>
    %157 = vector.broadcast %7 : vector<1x4xf32> to vector<2x4xf32>
    %158 = arith.addf %156, %157 : vector<2x4xf32>
    %159 = vector.extract_strided_slice %158 {offsets = [0, 0], sizes = [2, 1], strides = [1, 1]} : vector<2x4xf32> to vector<2x1xf32>
    %cst_46 = arith.constant 5.000000e-01 : f32
    %160 = vector.broadcast %cst_46 : f32 to vector<2x1xf32>
    %161 = arith.mulf %160, %159 : vector<2x1xf32>
    %162 = math.tanh %161 : vector<2x1xf32>
    %cst_47 = arith.constant 1.000000e+00 : f32
    %163 = vector.broadcast %cst_47 : f32 to vector<2x1xf32>
    %164 = arith.addf %162, %163 : vector<2x1xf32>
    %cst_48 = arith.constant 5.000000e-01 : f32
    %165 = vector.broadcast %cst_48 : f32 to vector<2x1xf32>
    %166 = arith.mulf %165, %164 : vector<2x1xf32>
    %167 = vector.extract_strided_slice %158 {offsets = [0, 1], sizes = [2, 1], strides = [1, 1]} : vector<2x4xf32> to vector<2x1xf32>
    %cst_49 = arith.constant 5.000000e-01 : f32
    %168 = vector.broadcast %cst_49 : f32 to vector<2x1xf32>
    %169 = arith.mulf %168, %167 : vector<2x1xf32>
    %170 = math.tanh %169 : vector<2x1xf32>
    %cst_50 = arith.constant 1.000000e+00 : f32
    %171 = vector.broadcast %cst_50 : f32 to vector<2x1xf32>
    %172 = arith.addf %170, %171 : vector<2x1xf32>
    %cst_51 = arith.constant 5.000000e-01 : f32
    %173 = vector.broadcast %cst_51 : f32 to vector<2x1xf32>
    %174 = arith.mulf %173, %172 : vector<2x1xf32>
    %175 = vector.extract_strided_slice %158 {offsets = [0, 2], sizes = [2, 1], strides = [1, 1]} : vector<2x4xf32> to vector<2x1xf32>
    %176 = math.tanh %175 : vector<2x1xf32>
    %177 = vector.extract_strided_slice %158 {offsets = [0, 3], sizes = [2, 1], strides = [1, 1]} : vector<2x4xf32> to vector<2x1xf32>
    %cst_52 = arith.constant 5.000000e-01 : f32
    %178 = vector.broadcast %cst_52 : f32 to vector<2x1xf32>
    %179 = arith.mulf %178, %177 : vector<2x1xf32>
    %180 = math.tanh %179 : vector<2x1xf32>
    %cst_53 = arith.constant 1.000000e+00 : f32
    %181 = vector.broadcast %cst_53 : f32 to vector<2x1xf32>
    %182 = arith.addf %180, %181 : vector<2x1xf32>
    %cst_54 = arith.constant 5.000000e-01 : f32
    %183 = vector.broadcast %cst_54 : f32 to vector<2x1xf32>
    %184 = arith.mulf %183, %182 : vector<2x1xf32>
    %185 = arith.mulf %174, %107 : vector<2x1xf32>
    %186 = arith.mulf %166, %176 : vector<2x1xf32>
    %187 = arith.addf %185, %186 : vector<2x1xf32>
    %188 = math.tanh %187 : vector<2x1xf32>
    %189 = arith.mulf %184, %188 : vector<2x1xf32>
    %c1_i32 = arith.constant 1 : i32
    %190 = vector.broadcast %c1_i32 : i32 to vector<2x8xi32>
    %191 = arith.cmpi eq, %35, %190 : vector<2x8xi32>
    %cst_55 = arith.constant 0.000000e+00 : f32
    %192 = vector.shape_cast %189 : vector<2x1xf32> to vector<2x1xf32>
    %193 = vector.broadcast %192 : vector<2x1xf32> to vector<2x8xf32>
    %194 = vector.broadcast %cst_55 : f32 to vector<2x8xf32>
    %195 = arith.select %191, %193, %194 : vector<2x8xi1>, vector<2x8xf32>
    %196 = arith.addf %116, %195 : vector<2x8xf32>
    %197 = vector.extract_strided_slice %30 {offsets = [2, 0, 0], sizes = [1, 2, 204], strides = [1, 1, 1]} : vector<8x2x204xf32> to vector<1x2x204xf32>
    %198 = vector.shape_cast %197 : vector<1x2x204xf32> to vector<2x204xf32>
    %cst_56 = arith.constant dense<0.000000e+00> : vector<2x204xf32>
    %199 = tpu.matmul %151, %1, %cst_56 {dimension_numbers = #tpu.dot_dimension_numbers<[1], [0], [0], [1], [0, 0, 1, 1], [], []>} : vector<2x51xf32>, vector<51x204xf32>, vector<2x204xf32> -> vector<2x204xf32>
    %200 = arith.addf %198, %199 : vector<2x204xf32>
    %201 = vector.extract_strided_slice %200 {offsets = [0, 0], sizes = [2, 51], strides = [1, 1]} : vector<2x204xf32> to vector<2x51xf32>
    %cst_57 = arith.constant 5.000000e-01 : f32
    %202 = vector.broadcast %cst_57 : f32 to vector<2x51xf32>
    %203 = arith.mulf %202, %201 : vector<2x51xf32>
    %204 = math.tanh %203 : vector<2x51xf32>
    %cst_58 = arith.constant 1.000000e+00 : f32
    %205 = vector.broadcast %cst_58 : f32 to vector<2x51xf32>
    %206 = arith.addf %204, %205 : vector<2x51xf32>
    %cst_59 = arith.constant 5.000000e-01 : f32
    %207 = vector.broadcast %cst_59 : f32 to vector<2x51xf32>
    %208 = arith.mulf %207, %206 : vector<2x51xf32>
    %209 = vector.extract_strided_slice %200 {offsets = [0, 51], sizes = [2, 51], strides = [1, 1]} : vector<2x204xf32> to vector<2x51xf32>
    %cst_60 = arith.constant 5.000000e-01 : f32
    %210 = vector.broadcast %cst_60 : f32 to vector<2x51xf32>
    %211 = arith.mulf %210, %209 : vector<2x51xf32>
    %212 = math.tanh %211 : vector<2x51xf32>
    %cst_61 = arith.constant 1.000000e+00 : f32
    %213 = vector.broadcast %cst_61 : f32 to vector<2x51xf32>
    %214 = arith.addf %212, %213 : vector<2x51xf32>
    %cst_62 = arith.constant 5.000000e-01 : f32
    %215 = vector.broadcast %cst_62 : f32 to vector<2x51xf32>
    %216 = arith.mulf %215, %214 : vector<2x51xf32>
    %217 = vector.extract_strided_slice %200 {offsets = [0, 102], sizes = [2, 51], strides = [1, 1]} : vector<2x204xf32> to vector<2x51xf32>
    %218 = math.tanh %217 : vector<2x51xf32>
    %219 = vector.extract_strided_slice %200 {offsets = [0, 153], sizes = [2, 51], strides = [1, 1]} : vector<2x204xf32> to vector<2x51xf32>
    %cst_63 = arith.constant 5.000000e-01 : f32
    %220 = vector.broadcast %cst_63 : f32 to vector<2x51xf32>
    %221 = arith.mulf %220, %219 : vector<2x51xf32>
    %222 = math.tanh %221 : vector<2x51xf32>
    %cst_64 = arith.constant 1.000000e+00 : f32
    %223 = vector.broadcast %cst_64 : f32 to vector<2x51xf32>
    %224 = arith.addf %222, %223 : vector<2x51xf32>
    %cst_65 = arith.constant 5.000000e-01 : f32
    %225 = vector.broadcast %cst_65 : f32 to vector<2x51xf32>
    %226 = arith.mulf %225, %224 : vector<2x51xf32>
    %227 = arith.mulf %216, %149 : vector<2x51xf32>
    %228 = arith.mulf %208, %218 : vector<2x51xf32>
    %229 = arith.addf %227, %228 : vector<2x51xf32>
    %230 = math.tanh %229 : vector<2x51xf32>
    %231 = arith.mulf %226, %230 : vector<2x51xf32>
    %cst_66 = arith.constant dense<0.000000e+00> : vector<2x4xf32>
    %232 = tpu.matmul %231, %5, %cst_66 {dimension_numbers = #tpu.dot_dimension_numbers<[1], [0], [0], [1], [0, 0, 1, 1], [], []>} : vector<2x51xf32>, vector<51x4xf32>, vector<2x4xf32> -> vector<2x4xf32>
    %233 = vector.broadcast %189 : vector<2x1xf32> to vector<2x4xf32>
    %234 = vector.broadcast %6 : vector<1x4xf32> to vector<2x4xf32>
    %235 = arith.mulf %233, %234 : vector<2x4xf32>
    %236 = arith.addf %232, %235 : vector<2x4xf32>
    %237 = vector.broadcast %7 : vector<1x4xf32> to vector<2x4xf32>
    %238 = arith.addf %236, %237 : vector<2x4xf32>
    %239 = vector.extract_strided_slice %238 {offsets = [0, 0], sizes = [2, 1], strides = [1, 1]} : vector<2x4xf32> to vector<2x1xf32>
    %cst_67 = arith.constant 5.000000e-01 : f32
    %240 = vector.broadcast %cst_67 : f32 to vector<2x1xf32>
    %241 = arith.mulf %240, %239 : vector<2x1xf32>
    %242 = math.tanh %241 : vector<2x1xf32>
    %cst_68 = arith.constant 1.000000e+00 : f32
    %243 = vector.broadcast %cst_68 : f32 to vector<2x1xf32>
    %244 = arith.addf %242, %243 : vector<2x1xf32>
    %cst_69 = arith.constant 5.000000e-01 : f32
    %245 = vector.broadcast %cst_69 : f32 to vector<2x1xf32>
    %246 = arith.mulf %245, %244 : vector<2x1xf32>
    %247 = vector.extract_strided_slice %238 {offsets = [0, 1], sizes = [2, 1], strides = [1, 1]} : vector<2x4xf32> to vector<2x1xf32>
    %cst_70 = arith.constant 5.000000e-01 : f32
    %248 = vector.broadcast %cst_70 : f32 to vector<2x1xf32>
    %249 = arith.mulf %248, %247 : vector<2x1xf32>
    %250 = math.tanh %249 : vector<2x1xf32>
    %cst_71 = arith.constant 1.000000e+00 : f32
    %251 = vector.broadcast %cst_71 : f32 to vector<2x1xf32>
    %252 = arith.addf %250, %251 : vector<2x1xf32>
    %cst_72 = arith.constant 5.000000e-01 : f32
    %253 = vector.broadcast %cst_72 : f32 to vector<2x1xf32>
    %254 = arith.mulf %253, %252 : vector<2x1xf32>
    %255 = vector.extract_strided_slice %238 {offsets = [0, 2], sizes = [2, 1], strides = [1, 1]} : vector<2x4xf32> to vector<2x1xf32>
    %256 = math.tanh %255 : vector<2x1xf32>
    %257 = vector.extract_strided_slice %238 {offsets = [0, 3], sizes = [2, 1], strides = [1, 1]} : vector<2x4xf32> to vector<2x1xf32>
    %cst_73 = arith.constant 5.000000e-01 : f32
    %258 = vector.broadcast %cst_73 : f32 to vector<2x1xf32>
    %259 = arith.mulf %258, %257 : vector<2x1xf32>
    %260 = math.tanh %259 : vector<2x1xf32>
    %cst_74 = arith.constant 1.000000e+00 : f32
    %261 = vector.broadcast %cst_74 : f32 to vector<2x1xf32>
    %262 = arith.addf %260, %261 : vector<2x1xf32>
    %cst_75 = arith.constant 5.000000e-01 : f32
    %263 = vector.broadcast %cst_75 : f32 to vector<2x1xf32>
    %264 = arith.mulf %263, %262 : vector<2x1xf32>
    %265 = arith.mulf %254, %187 : vector<2x1xf32>
    %266 = arith.mulf %246, %256 : vector<2x1xf32>
    %267 = arith.addf %265, %266 : vector<2x1xf32>
    %268 = math.tanh %267 : vector<2x1xf32>
    %269 = arith.mulf %264, %268 : vector<2x1xf32>
    %c2_i32 = arith.constant 2 : i32
    %270 = vector.broadcast %c2_i32 : i32 to vector<2x8xi32>
    %271 = arith.cmpi eq, %35, %270 : vector<2x8xi32>
    %cst_76 = arith.constant 0.000000e+00 : f32
    %272 = vector.shape_cast %269 : vector<2x1xf32> to vector<2x1xf32>
    %273 = vector.broadcast %272 : vector<2x1xf32> to vector<2x8xf32>
    %274 = vector.broadcast %cst_76 : f32 to vector<2x8xf32>
    %275 = arith.select %271, %273, %274 : vector<2x8xi1>, vector<2x8xf32>
    %276 = arith.addf %196, %275 : vector<2x8xf32>
    %277 = vector.extract_strided_slice %30 {offsets = [3, 0, 0], sizes = [1, 2, 204], strides = [1, 1, 1]} : vector<8x2x204xf32> to vector<1x2x204xf32>
    %278 = vector.shape_cast %277 : vector<1x2x204xf32> to vector<2x204xf32>
    %cst_77 = arith.constant dense<0.000000e+00> : vector<2x204xf32>
    %279 = tpu.matmul %231, %1, %cst_77 {dimension_numbers = #tpu.dot_dimension_numbers<[1], [0], [0], [1], [0, 0, 1, 1], [], []>} : vector<2x51xf32>, vector<51x204xf32>, vector<2x204xf32> -> vector<2x204xf32>
    %280 = arith.addf %278, %279 : vector<2x204xf32>
    %281 = vector.extract_strided_slice %280 {offsets = [0, 0], sizes = [2, 51], strides = [1, 1]} : vector<2x204xf32> to vector<2x51xf32>
    %cst_78 = arith.constant 5.000000e-01 : f32
    %282 = vector.broadcast %cst_78 : f32 to vector<2x51xf32>
    %283 = arith.mulf %282, %281 : vector<2x51xf32>
    %284 = math.tanh %283 : vector<2x51xf32>
    %cst_79 = arith.constant 1.000000e+00 : f32
    %285 = vector.broadcast %cst_79 : f32 to vector<2x51xf32>
    %286 = arith.addf %284, %285 : vector<2x51xf32>
    %cst_80 = arith.constant 5.000000e-01 : f32
    %287 = vector.broadcast %cst_80 : f32 to vector<2x51xf32>
    %288 = arith.mulf %287, %286 : vector<2x51xf32>
    %289 = vector.extract_strided_slice %280 {offsets = [0, 51], sizes = [2, 51], strides = [1, 1]} : vector<2x204xf32> to vector<2x51xf32>
    %cst_81 = arith.constant 5.000000e-01 : f32
    %290 = vector.broadcast %cst_81 : f32 to vector<2x51xf32>
    %291 = arith.mulf %290, %289 : vector<2x51xf32>
    %292 = math.tanh %291 : vector<2x51xf32>
    %cst_82 = arith.constant 1.000000e+00 : f32
    %293 = vector.broadcast %cst_82 : f32 to vector<2x51xf32>
    %294 = arith.addf %292, %293 : vector<2x51xf32>
    %cst_83 = arith.constant 5.000000e-01 : f32
    %295 = vector.broadcast %cst_83 : f32 to vector<2x51xf32>
    %296 = arith.mulf %295, %294 : vector<2x51xf32>
    %297 = vector.extract_strided_slice %280 {offsets = [0, 102], sizes = [2, 51], strides = [1, 1]} : vector<2x204xf32> to vector<2x51xf32>
    %298 = math.tanh %297 : vector<2x51xf32>
    %299 = vector.extract_strided_slice %280 {offsets = [0, 153], sizes = [2, 51], strides = [1, 1]} : vector<2x204xf32> to vector<2x51xf32>
    %cst_84 = arith.constant 5.000000e-01 : f32
    %300 = vector.broadcast %cst_84 : f32 to vector<2x51xf32>
    %301 = arith.mulf %300, %299 : vector<2x51xf32>
    %302 = math.tanh %301 : vector<2x51xf32>
    %cst_85 = arith.constant 1.000000e+00 : f32
    %303 = vector.broadcast %cst_85 : f32 to vector<2x51xf32>
    %304 = arith.addf %302, %303 : vector<2x51xf32>
    %cst_86 = arith.constant 5.000000e-01 : f32
    %305 = vector.broadcast %cst_86 : f32 to vector<2x51xf32>
    %306 = arith.mulf %305, %304 : vector<2x51xf32>
    %307 = arith.mulf %296, %229 : vector<2x51xf32>
    %308 = arith.mulf %288, %298 : vector<2x51xf32>
    %309 = arith.addf %307, %308 : vector<2x51xf32>
    %310 = math.tanh %309 : vector<2x51xf32>
    %311 = arith.mulf %306, %310 : vector<2x51xf32>
    %cst_87 = arith.constant dense<0.000000e+00> : vector<2x4xf32>
    %312 = tpu.matmul %311, %5, %cst_87 {dimension_numbers = #tpu.dot_dimension_numbers<[1], [0], [0], [1], [0, 0, 1, 1], [], []>} : vector<2x51xf32>, vector<51x4xf32>, vector<2x4xf32> -> vector<2x4xf32>
    %313 = vector.broadcast %269 : vector<2x1xf32> to vector<2x4xf32>
    %314 = vector.broadcast %6 : vector<1x4xf32> to vector<2x4xf32>
    %315 = arith.mulf %313, %314 : vector<2x4xf32>
    %316 = arith.addf %312, %315 : vector<2x4xf32>
    %317 = vector.broadcast %7 : vector<1x4xf32> to vector<2x4xf32>
    %318 = arith.addf %316, %317 : vector<2x4xf32>
    %319 = vector.extract_strided_slice %318 {offsets = [0, 0], sizes = [2, 1], strides = [1, 1]} : vector<2x4xf32> to vector<2x1xf32>
    %cst_88 = arith.constant 5.000000e-01 : f32
    %320 = vector.broadcast %cst_88 : f32 to vector<2x1xf32>
    %321 = arith.mulf %320, %319 : vector<2x1xf32>
    %322 = math.tanh %321 : vector<2x1xf32>
    %cst_89 = arith.constant 1.000000e+00 : f32
    %323 = vector.broadcast %cst_89 : f32 to vector<2x1xf32>
    %324 = arith.addf %322, %323 : vector<2x1xf32>
    %cst_90 = arith.constant 5.000000e-01 : f32
    %325 = vector.broadcast %cst_90 : f32 to vector<2x1xf32>
    %326 = arith.mulf %325, %324 : vector<2x1xf32>
    %327 = vector.extract_strided_slice %318 {offsets = [0, 1], sizes = [2, 1], strides = [1, 1]} : vector<2x4xf32> to vector<2x1xf32>
    %cst_91 = arith.constant 5.000000e-01 : f32
    %328 = vector.broadcast %cst_91 : f32 to vector<2x1xf32>
    %329 = arith.mulf %328, %327 : vector<2x1xf32>
    %330 = math.tanh %329 : vector<2x1xf32>
    %cst_92 = arith.constant 1.000000e+00 : f32
    %331 = vector.broadcast %cst_92 : f32 to vector<2x1xf32>
    %332 = arith.addf %330, %331 : vector<2x1xf32>
    %cst_93 = arith.constant 5.000000e-01 : f32
    %333 = vector.broadcast %cst_93 : f32 to vector<2x1xf32>
    %334 = arith.mulf %333, %332 : vector<2x1xf32>
    %335 = vector.extract_strided_slice %318 {offsets = [0, 2], sizes = [2, 1], strides = [1, 1]} : vector<2x4xf32> to vector<2x1xf32>
    %336 = math.tanh %335 : vector<2x1xf32>
    %337 = vector.extract_strided_slice %318 {offsets = [0, 3], sizes = [2, 1], strides = [1, 1]} : vector<2x4xf32> to vector<2x1xf32>
    %cst_94 = arith.constant 5.000000e-01 : f32
    %338 = vector.broadcast %cst_94 : f32 to vector<2x1xf32>
    %339 = arith.mulf %338, %337 : vector<2x1xf32>
    %340 = math.tanh %339 : vector<2x1xf32>
    %cst_95 = arith.constant 1.000000e+00 : f32
    %341 = vector.broadcast %cst_95 : f32 to vector<2x1xf32>
    %342 = arith.addf %340, %341 : vector<2x1xf32>
    %cst_96 = arith.constant 5.000000e-01 : f32
    %343 = vector.broadcast %cst_96 : f32 to vector<2x1xf32>
    %344 = arith.mulf %343, %342 : vector<2x1xf32>
    %345 = arith.mulf %334, %267 : vector<2x1xf32>
    %346 = arith.mulf %326, %336 : vector<2x1xf32>
    %347 = arith.addf %345, %346 : vector<2x1xf32>
    %348 = math.tanh %347 : vector<2x1xf32>
    %349 = arith.mulf %344, %348 : vector<2x1xf32>
    %c3_i32 = arith.constant 3 : i32
    %350 = vector.broadcast %c3_i32 : i32 to vector<2x8xi32>
    %351 = arith.cmpi eq, %35, %350 : vector<2x8xi32>
    %cst_97 = arith.constant 0.000000e+00 : f32
    %352 = vector.shape_cast %349 : vector<2x1xf32> to vector<2x1xf32>
    %353 = vector.broadcast %352 : vector<2x1xf32> to vector<2x8xf32>
    %354 = vector.broadcast %cst_97 : f32 to vector<2x8xf32>
    %355 = arith.select %351, %353, %354 : vector<2x8xi1>, vector<2x8xf32>
    %356 = arith.addf %276, %355 : vector<2x8xf32>
    %357 = vector.extract_strided_slice %30 {offsets = [4, 0, 0], sizes = [1, 2, 204], strides = [1, 1, 1]} : vector<8x2x204xf32> to vector<1x2x204xf32>
    %358 = vector.shape_cast %357 : vector<1x2x204xf32> to vector<2x204xf32>
    %cst_98 = arith.constant dense<0.000000e+00> : vector<2x204xf32>
    %359 = tpu.matmul %311, %1, %cst_98 {dimension_numbers = #tpu.dot_dimension_numbers<[1], [0], [0], [1], [0, 0, 1, 1], [], []>} : vector<2x51xf32>, vector<51x204xf32>, vector<2x204xf32> -> vector<2x204xf32>
    %360 = arith.addf %358, %359 : vector<2x204xf32>
    %361 = vector.extract_strided_slice %360 {offsets = [0, 0], sizes = [2, 51], strides = [1, 1]} : vector<2x204xf32> to vector<2x51xf32>
    %cst_99 = arith.constant 5.000000e-01 : f32
    %362 = vector.broadcast %cst_99 : f32 to vector<2x51xf32>
    %363 = arith.mulf %362, %361 : vector<2x51xf32>
    %364 = math.tanh %363 : vector<2x51xf32>
    %cst_100 = arith.constant 1.000000e+00 : f32
    %365 = vector.broadcast %cst_100 : f32 to vector<2x51xf32>
    %366 = arith.addf %364, %365 : vector<2x51xf32>
    %cst_101 = arith.constant 5.000000e-01 : f32
    %367 = vector.broadcast %cst_101 : f32 to vector<2x51xf32>
    %368 = arith.mulf %367, %366 : vector<2x51xf32>
    %369 = vector.extract_strided_slice %360 {offsets = [0, 51], sizes = [2, 51], strides = [1, 1]} : vector<2x204xf32> to vector<2x51xf32>
    %cst_102 = arith.constant 5.000000e-01 : f32
    %370 = vector.broadcast %cst_102 : f32 to vector<2x51xf32>
    %371 = arith.mulf %370, %369 : vector<2x51xf32>
    %372 = math.tanh %371 : vector<2x51xf32>
    %cst_103 = arith.constant 1.000000e+00 : f32
    %373 = vector.broadcast %cst_103 : f32 to vector<2x51xf32>
    %374 = arith.addf %372, %373 : vector<2x51xf32>
    %cst_104 = arith.constant 5.000000e-01 : f32
    %375 = vector.broadcast %cst_104 : f32 to vector<2x51xf32>
    %376 = arith.mulf %375, %374 : vector<2x51xf32>
    %377 = vector.extract_strided_slice %360 {offsets = [0, 102], sizes = [2, 51], strides = [1, 1]} : vector<2x204xf32> to vector<2x51xf32>
    %378 = math.tanh %377 : vector<2x51xf32>
    %379 = vector.extract_strided_slice %360 {offsets = [0, 153], sizes = [2, 51], strides = [1, 1]} : vector<2x204xf32> to vector<2x51xf32>
    %cst_105 = arith.constant 5.000000e-01 : f32
    %380 = vector.broadcast %cst_105 : f32 to vector<2x51xf32>
    %381 = arith.mulf %380, %379 : vector<2x51xf32>
    %382 = math.tanh %381 : vector<2x51xf32>
    %cst_106 = arith.constant 1.000000e+00 : f32
    %383 = vector.broadcast %cst_106 : f32 to vector<2x51xf32>
    %384 = arith.addf %382, %383 : vector<2x51xf32>
    %cst_107 = arith.constant 5.000000e-01 : f32
    %385 = vector.broadcast %cst_107 : f32 to vector<2x51xf32>
    %386 = arith.mulf %385, %384 : vector<2x51xf32>
    %387 = arith.mulf %376, %309 : vector<2x51xf32>
    %388 = arith.mulf %368, %378 : vector<2x51xf32>
    %389 = arith.addf %387, %388 : vector<2x51xf32>
    %390 = math.tanh %389 : vector<2x51xf32>
    %391 = arith.mulf %386, %390 : vector<2x51xf32>
    %cst_108 = arith.constant dense<0.000000e+00> : vector<2x4xf32>
    %392 = tpu.matmul %391, %5, %cst_108 {dimension_numbers = #tpu.dot_dimension_numbers<[1], [0], [0], [1], [0, 0, 1, 1], [], []>} : vector<2x51xf32>, vector<51x4xf32>, vector<2x4xf32> -> vector<2x4xf32>
    %393 = vector.broadcast %349 : vector<2x1xf32> to vector<2x4xf32>
    %394 = vector.broadcast %6 : vector<1x4xf32> to vector<2x4xf32>
    %395 = arith.mulf %393, %394 : vector<2x4xf32>
    %396 = arith.addf %392, %395 : vector<2x4xf32>
    %397 = vector.broadcast %7 : vector<1x4xf32> to vector<2x4xf32>
    %398 = arith.addf %396, %397 : vector<2x4xf32>
    %399 = vector.extract_strided_slice %398 {offsets = [0, 0], sizes = [2, 1], strides = [1, 1]} : vector<2x4xf32> to vector<2x1xf32>
    %cst_109 = arith.constant 5.000000e-01 : f32
    %400 = vector.broadcast %cst_109 : f32 to vector<2x1xf32>
    %401 = arith.mulf %400, %399 : vector<2x1xf32>
    %402 = math.tanh %401 : vector<2x1xf32>
    %cst_110 = arith.constant 1.000000e+00 : f32
    %403 = vector.broadcast %cst_110 : f32 to vector<2x1xf32>
    %404 = arith.addf %402, %403 : vector<2x1xf32>
    %cst_111 = arith.constant 5.000000e-01 : f32
    %405 = vector.broadcast %cst_111 : f32 to vector<2x1xf32>
    %406 = arith.mulf %405, %404 : vector<2x1xf32>
    %407 = vector.extract_strided_slice %398 {offsets = [0, 1], sizes = [2, 1], strides = [1, 1]} : vector<2x4xf32> to vector<2x1xf32>
    %cst_112 = arith.constant 5.000000e-01 : f32
    %408 = vector.broadcast %cst_112 : f32 to vector<2x1xf32>
    %409 = arith.mulf %408, %407 : vector<2x1xf32>
    %410 = math.tanh %409 : vector<2x1xf32>
    %cst_113 = arith.constant 1.000000e+00 : f32
    %411 = vector.broadcast %cst_113 : f32 to vector<2x1xf32>
    %412 = arith.addf %410, %411 : vector<2x1xf32>
    %cst_114 = arith.constant 5.000000e-01 : f32
    %413 = vector.broadcast %cst_114 : f32 to vector<2x1xf32>
    %414 = arith.mulf %413, %412 : vector<2x1xf32>
    %415 = vector.extract_strided_slice %398 {offsets = [0, 2], sizes = [2, 1], strides = [1, 1]} : vector<2x4xf32> to vector<2x1xf32>
    %416 = math.tanh %415 : vector<2x1xf32>
    %417 = vector.extract_strided_slice %398 {offsets = [0, 3], sizes = [2, 1], strides = [1, 1]} : vector<2x4xf32> to vector<2x1xf32>
    %cst_115 = arith.constant 5.000000e-01 : f32
    %418 = vector.broadcast %cst_115 : f32 to vector<2x1xf32>
    %419 = arith.mulf %418, %417 : vector<2x1xf32>
    %420 = math.tanh %419 : vector<2x1xf32>
    %cst_116 = arith.constant 1.000000e+00 : f32
    %421 = vector.broadcast %cst_116 : f32 to vector<2x1xf32>
    %422 = arith.addf %420, %421 : vector<2x1xf32>
    %cst_117 = arith.constant 5.000000e-01 : f32
    %423 = vector.broadcast %cst_117 : f32 to vector<2x1xf32>
    %424 = arith.mulf %423, %422 : vector<2x1xf32>
    %425 = arith.mulf %414, %347 : vector<2x1xf32>
    %426 = arith.mulf %406, %416 : vector<2x1xf32>
    %427 = arith.addf %425, %426 : vector<2x1xf32>
    %428 = math.tanh %427 : vector<2x1xf32>
    %429 = arith.mulf %424, %428 : vector<2x1xf32>
    %c4_i32 = arith.constant 4 : i32
    %430 = vector.broadcast %c4_i32 : i32 to vector<2x8xi32>
    %431 = arith.cmpi eq, %35, %430 : vector<2x8xi32>
    %cst_118 = arith.constant 0.000000e+00 : f32
    %432 = vector.shape_cast %429 : vector<2x1xf32> to vector<2x1xf32>
    %433 = vector.broadcast %432 : vector<2x1xf32> to vector<2x8xf32>
    %434 = vector.broadcast %cst_118 : f32 to vector<2x8xf32>
    %435 = arith.select %431, %433, %434 : vector<2x8xi1>, vector<2x8xf32>
    %436 = arith.addf %356, %435 : vector<2x8xf32>
    %437 = vector.extract_strided_slice %30 {offsets = [5, 0, 0], sizes = [1, 2, 204], strides = [1, 1, 1]} : vector<8x2x204xf32> to vector<1x2x204xf32>
    %438 = vector.shape_cast %437 : vector<1x2x204xf32> to vector<2x204xf32>
    %cst_119 = arith.constant dense<0.000000e+00> : vector<2x204xf32>
    %439 = tpu.matmul %391, %1, %cst_119 {dimension_numbers = #tpu.dot_dimension_numbers<[1], [0], [0], [1], [0, 0, 1, 1], [], []>} : vector<2x51xf32>, vector<51x204xf32>, vector<2x204xf32> -> vector<2x204xf32>
    %440 = arith.addf %438, %439 : vector<2x204xf32>
    %441 = vector.extract_strided_slice %440 {offsets = [0, 0], sizes = [2, 51], strides = [1, 1]} : vector<2x204xf32> to vector<2x51xf32>
    %cst_120 = arith.constant 5.000000e-01 : f32
    %442 = vector.broadcast %cst_120 : f32 to vector<2x51xf32>
    %443 = arith.mulf %442, %441 : vector<2x51xf32>
    %444 = math.tanh %443 : vector<2x51xf32>
    %cst_121 = arith.constant 1.000000e+00 : f32
    %445 = vector.broadcast %cst_121 : f32 to vector<2x51xf32>
    %446 = arith.addf %444, %445 : vector<2x51xf32>
    %cst_122 = arith.constant 5.000000e-01 : f32
    %447 = vector.broadcast %cst_122 : f32 to vector<2x51xf32>
    %448 = arith.mulf %447, %446 : vector<2x51xf32>
    %449 = vector.extract_strided_slice %440 {offsets = [0, 51], sizes = [2, 51], strides = [1, 1]} : vector<2x204xf32> to vector<2x51xf32>
    %cst_123 = arith.constant 5.000000e-01 : f32
    %450 = vector.broadcast %cst_123 : f32 to vector<2x51xf32>
    %451 = arith.mulf %450, %449 : vector<2x51xf32>
    %452 = math.tanh %451 : vector<2x51xf32>
    %cst_124 = arith.constant 1.000000e+00 : f32
    %453 = vector.broadcast %cst_124 : f32 to vector<2x51xf32>
    %454 = arith.addf %452, %453 : vector<2x51xf32>
    %cst_125 = arith.constant 5.000000e-01 : f32
    %455 = vector.broadcast %cst_125 : f32 to vector<2x51xf32>
    %456 = arith.mulf %455, %454 : vector<2x51xf32>
    %457 = vector.extract_strided_slice %440 {offsets = [0, 102], sizes = [2, 51], strides = [1, 1]} : vector<2x204xf32> to vector<2x51xf32>
    %458 = math.tanh %457 : vector<2x51xf32>
    %459 = vector.extract_strided_slice %440 {offsets = [0, 153], sizes = [2, 51], strides = [1, 1]} : vector<2x204xf32> to vector<2x51xf32>
    %cst_126 = arith.constant 5.000000e-01 : f32
    %460 = vector.broadcast %cst_126 : f32 to vector<2x51xf32>
    %461 = arith.mulf %460, %459 : vector<2x51xf32>
    %462 = math.tanh %461 : vector<2x51xf32>
    %cst_127 = arith.constant 1.000000e+00 : f32
    %463 = vector.broadcast %cst_127 : f32 to vector<2x51xf32>
    %464 = arith.addf %462, %463 : vector<2x51xf32>
    %cst_128 = arith.constant 5.000000e-01 : f32
    %465 = vector.broadcast %cst_128 : f32 to vector<2x51xf32>
    %466 = arith.mulf %465, %464 : vector<2x51xf32>
    %467 = arith.mulf %456, %389 : vector<2x51xf32>
    %468 = arith.mulf %448, %458 : vector<2x51xf32>
    %469 = arith.addf %467, %468 : vector<2x51xf32>
    %470 = math.tanh %469 : vector<2x51xf32>
    %471 = arith.mulf %466, %470 : vector<2x51xf32>
    %cst_129 = arith.constant dense<0.000000e+00> : vector<2x4xf32>
    %472 = tpu.matmul %471, %5, %cst_129 {dimension_numbers = #tpu.dot_dimension_numbers<[1], [0], [0], [1], [0, 0, 1, 1], [], []>} : vector<2x51xf32>, vector<51x4xf32>, vector<2x4xf32> -> vector<2x4xf32>
    %473 = vector.broadcast %429 : vector<2x1xf32> to vector<2x4xf32>
    %474 = vector.broadcast %6 : vector<1x4xf32> to vector<2x4xf32>
    %475 = arith.mulf %473, %474 : vector<2x4xf32>
    %476 = arith.addf %472, %475 : vector<2x4xf32>
    %477 = vector.broadcast %7 : vector<1x4xf32> to vector<2x4xf32>
    %478 = arith.addf %476, %477 : vector<2x4xf32>
    %479 = vector.extract_strided_slice %478 {offsets = [0, 0], sizes = [2, 1], strides = [1, 1]} : vector<2x4xf32> to vector<2x1xf32>
    %cst_130 = arith.constant 5.000000e-01 : f32
    %480 = vector.broadcast %cst_130 : f32 to vector<2x1xf32>
    %481 = arith.mulf %480, %479 : vector<2x1xf32>
    %482 = math.tanh %481 : vector<2x1xf32>
    %cst_131 = arith.constant 1.000000e+00 : f32
    %483 = vector.broadcast %cst_131 : f32 to vector<2x1xf32>
    %484 = arith.addf %482, %483 : vector<2x1xf32>
    %cst_132 = arith.constant 5.000000e-01 : f32
    %485 = vector.broadcast %cst_132 : f32 to vector<2x1xf32>
    %486 = arith.mulf %485, %484 : vector<2x1xf32>
    %487 = vector.extract_strided_slice %478 {offsets = [0, 1], sizes = [2, 1], strides = [1, 1]} : vector<2x4xf32> to vector<2x1xf32>
    %cst_133 = arith.constant 5.000000e-01 : f32
    %488 = vector.broadcast %cst_133 : f32 to vector<2x1xf32>
    %489 = arith.mulf %488, %487 : vector<2x1xf32>
    %490 = math.tanh %489 : vector<2x1xf32>
    %cst_134 = arith.constant 1.000000e+00 : f32
    %491 = vector.broadcast %cst_134 : f32 to vector<2x1xf32>
    %492 = arith.addf %490, %491 : vector<2x1xf32>
    %cst_135 = arith.constant 5.000000e-01 : f32
    %493 = vector.broadcast %cst_135 : f32 to vector<2x1xf32>
    %494 = arith.mulf %493, %492 : vector<2x1xf32>
    %495 = vector.extract_strided_slice %478 {offsets = [0, 2], sizes = [2, 1], strides = [1, 1]} : vector<2x4xf32> to vector<2x1xf32>
    %496 = math.tanh %495 : vector<2x1xf32>
    %497 = vector.extract_strided_slice %478 {offsets = [0, 3], sizes = [2, 1], strides = [1, 1]} : vector<2x4xf32> to vector<2x1xf32>
    %cst_136 = arith.constant 5.000000e-01 : f32
    %498 = vector.broadcast %cst_136 : f32 to vector<2x1xf32>
    %499 = arith.mulf %498, %497 : vector<2x1xf32>
    %500 = math.tanh %499 : vector<2x1xf32>
    %cst_137 = arith.constant 1.000000e+00 : f32
    %501 = vector.broadcast %cst_137 : f32 to vector<2x1xf32>
    %502 = arith.addf %500, %501 : vector<2x1xf32>
    %cst_138 = arith.constant 5.000000e-01 : f32
    %503 = vector.broadcast %cst_138 : f32 to vector<2x1xf32>
    %504 = arith.mulf %503, %502 : vector<2x1xf32>
    %505 = arith.mulf %494, %427 : vector<2x1xf32>
    %506 = arith.mulf %486, %496 : vector<2x1xf32>
    %507 = arith.addf %505, %506 : vector<2x1xf32>
    %508 = math.tanh %507 : vector<2x1xf32>
    %509 = arith.mulf %504, %508 : vector<2x1xf32>
    %c5_i32 = arith.constant 5 : i32
    %510 = vector.broadcast %c5_i32 : i32 to vector<2x8xi32>
    %511 = arith.cmpi eq, %35, %510 : vector<2x8xi32>
    %cst_139 = arith.constant 0.000000e+00 : f32
    %512 = vector.shape_cast %509 : vector<2x1xf32> to vector<2x1xf32>
    %513 = vector.broadcast %512 : vector<2x1xf32> to vector<2x8xf32>
    %514 = vector.broadcast %cst_139 : f32 to vector<2x8xf32>
    %515 = arith.select %511, %513, %514 : vector<2x8xi1>, vector<2x8xf32>
    %516 = arith.addf %436, %515 : vector<2x8xf32>
    %517 = vector.extract_strided_slice %30 {offsets = [6, 0, 0], sizes = [1, 2, 204], strides = [1, 1, 1]} : vector<8x2x204xf32> to vector<1x2x204xf32>
    %518 = vector.shape_cast %517 : vector<1x2x204xf32> to vector<2x204xf32>
    %cst_140 = arith.constant dense<0.000000e+00> : vector<2x204xf32>
    %519 = tpu.matmul %471, %1, %cst_140 {dimension_numbers = #tpu.dot_dimension_numbers<[1], [0], [0], [1], [0, 0, 1, 1], [], []>} : vector<2x51xf32>, vector<51x204xf32>, vector<2x204xf32> -> vector<2x204xf32>
    %520 = arith.addf %518, %519 : vector<2x204xf32>
    %521 = vector.extract_strided_slice %520 {offsets = [0, 0], sizes = [2, 51], strides = [1, 1]} : vector<2x204xf32> to vector<2x51xf32>
    %cst_141 = arith.constant 5.000000e-01 : f32
    %522 = vector.broadcast %cst_141 : f32 to vector<2x51xf32>
    %523 = arith.mulf %522, %521 : vector<2x51xf32>
    %524 = math.tanh %523 : vector<2x51xf32>
    %cst_142 = arith.constant 1.000000e+00 : f32
    %525 = vector.broadcast %cst_142 : f32 to vector<2x51xf32>
    %526 = arith.addf %524, %525 : vector<2x51xf32>
    %cst_143 = arith.constant 5.000000e-01 : f32
    %527 = vector.broadcast %cst_143 : f32 to vector<2x51xf32>
    %528 = arith.mulf %527, %526 : vector<2x51xf32>
    %529 = vector.extract_strided_slice %520 {offsets = [0, 51], sizes = [2, 51], strides = [1, 1]} : vector<2x204xf32> to vector<2x51xf32>
    %cst_144 = arith.constant 5.000000e-01 : f32
    %530 = vector.broadcast %cst_144 : f32 to vector<2x51xf32>
    %531 = arith.mulf %530, %529 : vector<2x51xf32>
    %532 = math.tanh %531 : vector<2x51xf32>
    %cst_145 = arith.constant 1.000000e+00 : f32
    %533 = vector.broadcast %cst_145 : f32 to vector<2x51xf32>
    %534 = arith.addf %532, %533 : vector<2x51xf32>
    %cst_146 = arith.constant 5.000000e-01 : f32
    %535 = vector.broadcast %cst_146 : f32 to vector<2x51xf32>
    %536 = arith.mulf %535, %534 : vector<2x51xf32>
    %537 = vector.extract_strided_slice %520 {offsets = [0, 102], sizes = [2, 51], strides = [1, 1]} : vector<2x204xf32> to vector<2x51xf32>
    %538 = math.tanh %537 : vector<2x51xf32>
    %539 = vector.extract_strided_slice %520 {offsets = [0, 153], sizes = [2, 51], strides = [1, 1]} : vector<2x204xf32> to vector<2x51xf32>
    %cst_147 = arith.constant 5.000000e-01 : f32
    %540 = vector.broadcast %cst_147 : f32 to vector<2x51xf32>
    %541 = arith.mulf %540, %539 : vector<2x51xf32>
    %542 = math.tanh %541 : vector<2x51xf32>
    %cst_148 = arith.constant 1.000000e+00 : f32
    %543 = vector.broadcast %cst_148 : f32 to vector<2x51xf32>
    %544 = arith.addf %542, %543 : vector<2x51xf32>
    %cst_149 = arith.constant 5.000000e-01 : f32
    %545 = vector.broadcast %cst_149 : f32 to vector<2x51xf32>
    %546 = arith.mulf %545, %544 : vector<2x51xf32>
    %547 = arith.mulf %536, %469 : vector<2x51xf32>
    %548 = arith.mulf %528, %538 : vector<2x51xf32>
    %549 = arith.addf %547, %548 : vector<2x51xf32>
    %550 = math.tanh %549 : vector<2x51xf32>
    %551 = arith.mulf %546, %550 : vector<2x51xf32>
    %cst_150 = arith.constant dense<0.000000e+00> : vector<2x4xf32>
    %552 = tpu.matmul %551, %5, %cst_150 {dimension_numbers = #tpu.dot_dimension_numbers<[1], [0], [0], [1], [0, 0, 1, 1], [], []>} : vector<2x51xf32>, vector<51x4xf32>, vector<2x4xf32> -> vector<2x4xf32>
    %553 = vector.broadcast %509 : vector<2x1xf32> to vector<2x4xf32>
    %554 = vector.broadcast %6 : vector<1x4xf32> to vector<2x4xf32>
    %555 = arith.mulf %553, %554 : vector<2x4xf32>
    %556 = arith.addf %552, %555 : vector<2x4xf32>
    %557 = vector.broadcast %7 : vector<1x4xf32> to vector<2x4xf32>
    %558 = arith.addf %556, %557 : vector<2x4xf32>
    %559 = vector.extract_strided_slice %558 {offsets = [0, 0], sizes = [2, 1], strides = [1, 1]} : vector<2x4xf32> to vector<2x1xf32>
    %cst_151 = arith.constant 5.000000e-01 : f32
    %560 = vector.broadcast %cst_151 : f32 to vector<2x1xf32>
    %561 = arith.mulf %560, %559 : vector<2x1xf32>
    %562 = math.tanh %561 : vector<2x1xf32>
    %cst_152 = arith.constant 1.000000e+00 : f32
    %563 = vector.broadcast %cst_152 : f32 to vector<2x1xf32>
    %564 = arith.addf %562, %563 : vector<2x1xf32>
    %cst_153 = arith.constant 5.000000e-01 : f32
    %565 = vector.broadcast %cst_153 : f32 to vector<2x1xf32>
    %566 = arith.mulf %565, %564 : vector<2x1xf32>
    %567 = vector.extract_strided_slice %558 {offsets = [0, 1], sizes = [2, 1], strides = [1, 1]} : vector<2x4xf32> to vector<2x1xf32>
    %cst_154 = arith.constant 5.000000e-01 : f32
    %568 = vector.broadcast %cst_154 : f32 to vector<2x1xf32>
    %569 = arith.mulf %568, %567 : vector<2x1xf32>
    %570 = math.tanh %569 : vector<2x1xf32>
    %cst_155 = arith.constant 1.000000e+00 : f32
    %571 = vector.broadcast %cst_155 : f32 to vector<2x1xf32>
    %572 = arith.addf %570, %571 : vector<2x1xf32>
    %cst_156 = arith.constant 5.000000e-01 : f32
    %573 = vector.broadcast %cst_156 : f32 to vector<2x1xf32>
    %574 = arith.mulf %573, %572 : vector<2x1xf32>
    %575 = vector.extract_strided_slice %558 {offsets = [0, 2], sizes = [2, 1], strides = [1, 1]} : vector<2x4xf32> to vector<2x1xf32>
    %576 = math.tanh %575 : vector<2x1xf32>
    %577 = vector.extract_strided_slice %558 {offsets = [0, 3], sizes = [2, 1], strides = [1, 1]} : vector<2x4xf32> to vector<2x1xf32>
    %cst_157 = arith.constant 5.000000e-01 : f32
    %578 = vector.broadcast %cst_157 : f32 to vector<2x1xf32>
    %579 = arith.mulf %578, %577 : vector<2x1xf32>
    %580 = math.tanh %579 : vector<2x1xf32>
    %cst_158 = arith.constant 1.000000e+00 : f32
    %581 = vector.broadcast %cst_158 : f32 to vector<2x1xf32>
    %582 = arith.addf %580, %581 : vector<2x1xf32>
    %cst_159 = arith.constant 5.000000e-01 : f32
    %583 = vector.broadcast %cst_159 : f32 to vector<2x1xf32>
    %584 = arith.mulf %583, %582 : vector<2x1xf32>
    %585 = arith.mulf %574, %507 : vector<2x1xf32>
    %586 = arith.mulf %566, %576 : vector<2x1xf32>
    %587 = arith.addf %585, %586 : vector<2x1xf32>
    %588 = math.tanh %587 : vector<2x1xf32>
    %589 = arith.mulf %584, %588 : vector<2x1xf32>
    %c6_i32 = arith.constant 6 : i32
    %590 = vector.broadcast %c6_i32 : i32 to vector<2x8xi32>
    %591 = arith.cmpi eq, %35, %590 : vector<2x8xi32>
    %cst_160 = arith.constant 0.000000e+00 : f32
    %592 = vector.shape_cast %589 : vector<2x1xf32> to vector<2x1xf32>
    %593 = vector.broadcast %592 : vector<2x1xf32> to vector<2x8xf32>
    %594 = vector.broadcast %cst_160 : f32 to vector<2x8xf32>
    %595 = arith.select %591, %593, %594 : vector<2x8xi1>, vector<2x8xf32>
    %596 = arith.addf %516, %595 : vector<2x8xf32>
    %597 = vector.extract_strided_slice %30 {offsets = [7, 0, 0], sizes = [1, 2, 204], strides = [1, 1, 1]} : vector<8x2x204xf32> to vector<1x2x204xf32>
    %598 = vector.shape_cast %597 : vector<1x2x204xf32> to vector<2x204xf32>
    %cst_161 = arith.constant dense<0.000000e+00> : vector<2x204xf32>
    %599 = tpu.matmul %551, %1, %cst_161 {dimension_numbers = #tpu.dot_dimension_numbers<[1], [0], [0], [1], [0, 0, 1, 1], [], []>} : vector<2x51xf32>, vector<51x204xf32>, vector<2x204xf32> -> vector<2x204xf32>
    %600 = arith.addf %598, %599 : vector<2x204xf32>
    %601 = vector.extract_strided_slice %600 {offsets = [0, 0], sizes = [2, 51], strides = [1, 1]} : vector<2x204xf32> to vector<2x51xf32>
    %cst_162 = arith.constant 5.000000e-01 : f32
    %602 = vector.broadcast %cst_162 : f32 to vector<2x51xf32>
    %603 = arith.mulf %602, %601 : vector<2x51xf32>
    %604 = math.tanh %603 : vector<2x51xf32>
    %cst_163 = arith.constant 1.000000e+00 : f32
    %605 = vector.broadcast %cst_163 : f32 to vector<2x51xf32>
    %606 = arith.addf %604, %605 : vector<2x51xf32>
    %cst_164 = arith.constant 5.000000e-01 : f32
    %607 = vector.broadcast %cst_164 : f32 to vector<2x51xf32>
    %608 = arith.mulf %607, %606 : vector<2x51xf32>
    %609 = vector.extract_strided_slice %600 {offsets = [0, 51], sizes = [2, 51], strides = [1, 1]} : vector<2x204xf32> to vector<2x51xf32>
    %cst_165 = arith.constant 5.000000e-01 : f32
    %610 = vector.broadcast %cst_165 : f32 to vector<2x51xf32>
    %611 = arith.mulf %610, %609 : vector<2x51xf32>
    %612 = math.tanh %611 : vector<2x51xf32>
    %cst_166 = arith.constant 1.000000e+00 : f32
    %613 = vector.broadcast %cst_166 : f32 to vector<2x51xf32>
    %614 = arith.addf %612, %613 : vector<2x51xf32>
    %cst_167 = arith.constant 5.000000e-01 : f32
    %615 = vector.broadcast %cst_167 : f32 to vector<2x51xf32>
    %616 = arith.mulf %615, %614 : vector<2x51xf32>
    %617 = vector.extract_strided_slice %600 {offsets = [0, 102], sizes = [2, 51], strides = [1, 1]} : vector<2x204xf32> to vector<2x51xf32>
    %618 = math.tanh %617 : vector<2x51xf32>
    %619 = vector.extract_strided_slice %600 {offsets = [0, 153], sizes = [2, 51], strides = [1, 1]} : vector<2x204xf32> to vector<2x51xf32>
    %cst_168 = arith.constant 5.000000e-01 : f32
    %620 = vector.broadcast %cst_168 : f32 to vector<2x51xf32>
    %621 = arith.mulf %620, %619 : vector<2x51xf32>
    %622 = math.tanh %621 : vector<2x51xf32>
    %cst_169 = arith.constant 1.000000e+00 : f32
    %623 = vector.broadcast %cst_169 : f32 to vector<2x51xf32>
    %624 = arith.addf %622, %623 : vector<2x51xf32>
    %cst_170 = arith.constant 5.000000e-01 : f32
    %625 = vector.broadcast %cst_170 : f32 to vector<2x51xf32>
    %626 = arith.mulf %625, %624 : vector<2x51xf32>
    %627 = arith.mulf %616, %549 : vector<2x51xf32>
    %628 = arith.mulf %608, %618 : vector<2x51xf32>
    %629 = arith.addf %627, %628 : vector<2x51xf32>
    %630 = math.tanh %629 : vector<2x51xf32>
    %631 = arith.mulf %626, %630 : vector<2x51xf32>
    %cst_171 = arith.constant dense<0.000000e+00> : vector<2x4xf32>
    %632 = tpu.matmul %631, %5, %cst_171 {dimension_numbers = #tpu.dot_dimension_numbers<[1], [0], [0], [1], [0, 0, 1, 1], [], []>} : vector<2x51xf32>, vector<51x4xf32>, vector<2x4xf32> -> vector<2x4xf32>
    %633 = vector.broadcast %589 : vector<2x1xf32> to vector<2x4xf32>
    %634 = vector.broadcast %6 : vector<1x4xf32> to vector<2x4xf32>
    %635 = arith.mulf %633, %634 : vector<2x4xf32>
    %636 = arith.addf %632, %635 : vector<2x4xf32>
    %637 = vector.broadcast %7 : vector<1x4xf32> to vector<2x4xf32>
    %638 = arith.addf %636, %637 : vector<2x4xf32>
    %639 = vector.extract_strided_slice %638 {offsets = [0, 0], sizes = [2, 1], strides = [1, 1]} : vector<2x4xf32> to vector<2x1xf32>
    %cst_172 = arith.constant 5.000000e-01 : f32
    %640 = vector.broadcast %cst_172 : f32 to vector<2x1xf32>
    %641 = arith.mulf %640, %639 : vector<2x1xf32>
    %642 = math.tanh %641 : vector<2x1xf32>
    %cst_173 = arith.constant 1.000000e+00 : f32
    %643 = vector.broadcast %cst_173 : f32 to vector<2x1xf32>
    %644 = arith.addf %642, %643 : vector<2x1xf32>
    %cst_174 = arith.constant 5.000000e-01 : f32
    %645 = vector.broadcast %cst_174 : f32 to vector<2x1xf32>
    %646 = arith.mulf %645, %644 : vector<2x1xf32>
    %647 = vector.extract_strided_slice %638 {offsets = [0, 1], sizes = [2, 1], strides = [1, 1]} : vector<2x4xf32> to vector<2x1xf32>
    %cst_175 = arith.constant 5.000000e-01 : f32
    %648 = vector.broadcast %cst_175 : f32 to vector<2x1xf32>
    %649 = arith.mulf %648, %647 : vector<2x1xf32>
    %650 = math.tanh %649 : vector<2x1xf32>
    %cst_176 = arith.constant 1.000000e+00 : f32
    %651 = vector.broadcast %cst_176 : f32 to vector<2x1xf32>
    %652 = arith.addf %650, %651 : vector<2x1xf32>
    %cst_177 = arith.constant 5.000000e-01 : f32
    %653 = vector.broadcast %cst_177 : f32 to vector<2x1xf32>
    %654 = arith.mulf %653, %652 : vector<2x1xf32>
    %655 = vector.extract_strided_slice %638 {offsets = [0, 2], sizes = [2, 1], strides = [1, 1]} : vector<2x4xf32> to vector<2x1xf32>
    %656 = math.tanh %655 : vector<2x1xf32>
    %657 = vector.extract_strided_slice %638 {offsets = [0, 3], sizes = [2, 1], strides = [1, 1]} : vector<2x4xf32> to vector<2x1xf32>
    %cst_178 = arith.constant 5.000000e-01 : f32
    %658 = vector.broadcast %cst_178 : f32 to vector<2x1xf32>
    %659 = arith.mulf %658, %657 : vector<2x1xf32>
    %660 = math.tanh %659 : vector<2x1xf32>
    %cst_179 = arith.constant 1.000000e+00 : f32
    %661 = vector.broadcast %cst_179 : f32 to vector<2x1xf32>
    %662 = arith.addf %660, %661 : vector<2x1xf32>
    %cst_180 = arith.constant 5.000000e-01 : f32
    %663 = vector.broadcast %cst_180 : f32 to vector<2x1xf32>
    %664 = arith.mulf %663, %662 : vector<2x1xf32>
    %665 = arith.mulf %654, %587 : vector<2x1xf32>
    %666 = arith.mulf %646, %656 : vector<2x1xf32>
    %667 = arith.addf %665, %666 : vector<2x1xf32>
    %668 = math.tanh %667 : vector<2x1xf32>
    %669 = arith.mulf %664, %668 : vector<2x1xf32>
    %c7_i32 = arith.constant 7 : i32
    %670 = vector.broadcast %c7_i32 : i32 to vector<2x8xi32>
    %671 = arith.cmpi eq, %35, %670 : vector<2x8xi32>
    %cst_181 = arith.constant 0.000000e+00 : f32
    %672 = vector.shape_cast %669 : vector<2x1xf32> to vector<2x1xf32>
    %673 = vector.broadcast %672 : vector<2x1xf32> to vector<2x8xf32>
    %674 = vector.broadcast %cst_181 : f32 to vector<2x8xf32>
    %675 = arith.select %671, %673, %674 : vector<2x8xi1>, vector<2x8xf32>
    %676 = arith.addf %596, %675 : vector<2x8xf32>
    %677 = vector.broadcast %12 : vector<1x1xf32> to vector<2x8xf32>
    %678 = arith.mulf %676, %677 : vector<2x8xf32>
    %679 = vector.broadcast %13 : vector<1x1xf32> to vector<2x8xf32>
    %680 = arith.addf %678, %679 : vector<2x8xf32>
    %c0_182 = arith.constant 0 : index
    %c0_183 = arith.constant 0 : index
    %681 = vector.load %arg4[%c0_182, %c0_183] : memref<2x8xf32, #tpu.memory_space<vmem>>, vector<2x8xf32>
    tpu.vector_store %arg4[%c0_182, %c0_183], %680 {strides = array<i32>} : memref<2x8xf32, #tpu.memory_space<vmem>>, vector<2x8xf32>,
    return
  }
}

</mosaic_0001>

<bundles_post_ra>
// kernel: tpu_custom_call.1
= control target key start
LH: loop header
LB: loop body
LE: loop exit
PB: predicated region body
PF: predicated region fallthrough
CT: control target
= control target key end

     0   :  { %9 = vsyncpa [#allocation3], 0  ;;  %s3157_s0 = inlined_call_operand.vmem [shape: f32[8,2,49], index: 0, kind: input, shape index: {}]   ;;  %s3158_s1 = inlined_call_operand.hbm [shape: f32[53,204], index: 1, kind: input, shape index: {}]   ;;  %s3159_s2 = inlined_call_operand.vmem [shape: f32[53,4], index: 2, kind: input, shape index: {}]   ;;  %s3160_s3 = inlined_call_operand.vmem [shape: f32[2,49], index: 3, kind: input, shape index: {}]   ;;  %s3161_s4 = inlined_call_operand.hbm [shape: f32[2,8], index: 4, kind: output, shape index: {}]  }
   0x1   :  { %10 = vsyncpa [#allocation4], 0  ;;  %s2412_s15 = smov [#allocation2]  }
   0x2   :  { %s18_s16 = sshll.u32 %s2412_s15, 4  ;;  %s19_s16 = int_to_ptr.vmem [resolvable:$true] %s18_s16 }
   0x3   :  { %s2376_s17 = scalar_lea.vmem %s19_s16, 1792  ;;  %p2381_p1 = scmp.lt.s32.totalorder %s19_s16, %s19_s16 }
   0x4   :  { %p2377_p0 = scmp.ne.s32.totalorder %s19_s16, %s2376_s17  ;;  %p2382_p2 = scmp.lt.s32.totalorder %s2376_s17, %s2376_s17 }
   0x6   :  { %p2383_p3 = por %p2382_p2, %p2381_p1 }
   0x8   :  { %p2384_p4 = pnand %p2383_p3, %p2377_p0 }
   0xa   :  { %2387 = shalt.err (!%p2384_p4)
}
   0xb   :  { %s2413_s18 = smov 256   ;;  %s2414_s19 = smov 16  }
   0xc   :  { %24 = dma.hbm_to_vmem [thread:$0]  %s3158_s1, 1792, %s19_s16, [#allocation3], %s2413_s18, %s2413_s18, %s2414_s19  }
   0xd   :  { %2408 = dma.done.wait [#allocation3], 1792  }
   0xe   :  { %2409 = vsyncadd [#allocation3], 4294965504  ;;  %v62_v0 = vlaneseq  ;;  %v2415_v1 = vmov 0.0   ;;  %vm213_vm0 = vcmask 1042432   ;;  %v53_v4 = vld [vmem:[%s3160_s3] sm:$0x3] }
   0xf   :  { %284 = vmatprep.mubr.f32.mxu0 %v2415_v1  ;;  %2054 = vmatprep.subr.mxu1 %v2415_v1  ;;  %v54_v5 = vld [vmem:[%s3157_s0] sm:$0x3]  ;;  %v2468_v6 = vld [vmem:[#allocation2 + $0x68] sm:$0x1f]  ;;  %v2476_v9 = vld [vmem:[#allocation2 + $0x58] sm:$0xff]  ;;  %vm74_vm1 = vcmask 394240  }
  0x10   :  { %v2459_v2 = vshrl.u32 %v62_v0, 7  ;;  %1951 = vmatprep.subr.msk.mxu0 %vm213_vm0, %v2468_v6  ;;  %v2474_v8 = vld [vmem:[#allocation2 + $0x60] sm:$0x1f]  ;;  %v2478_v10 = vld [vmem:[#allocation2 + $0x50] sm:$0xff]  ;;  %v2482_v11 = vld [vmem:[#allocation2 + $0x48] sm:$0xff]  ;;  %v2416_v23 = vmov 0  }
  0x11   :  { %1952 = vmatpush1.msk.msra.mxu0 %vm213_vm0, %v2474_v8  ;;  %v2486_v13 = vld [vmem:[#allocation2 + $0x40] sm:$0xff]  ;;  %v2489_v14 = vld [vmem:[#allocation2 + $0x38] sm:$0xff]  ;;  %v2493_v16 = vld [vmem:[#allocation2 + $0x30] sm:$0xff]  ;;  %2210 = vset.pattern.permute.xlu0 %v2416_v23  ;;  %s2417_s25 = smov 26   ;;  %vm310_vm2 = vcmask 211968   ;;  %s2418_s26 = smov 51  }
  0x12   :  { %v64_v3 = vsub.s32 0, %v2459_v2  ;;  %240 = vmatprep.subr.mxu0 %v2476_v9  ;;  %v2496_v17 = vld [vmem:[#allocation2 + $0x28] sm:$0xff]  ;;  %v2499_v18 = vld [vmem:[#allocation2 + $0x20] sm:$0xff]  ;;  %v2502_v19 = vld [vmem:[#allocation2 + $0x18] sm:$0xff]  ;;  %2211 = vset.pattern.permute.xlu1 %v2416_v23  ;;  %v101_v24 = vsub.s32 1, %v2459_v2  ;;  %v2543_v29 = vsub.s32 3, %v2459_v2 }
  0x13   :  { %241 = vmatpush1.msra.mxu0 %v2478_v10  ;;  %v2505_v20 = vld [vmem:[#allocation2 + $0x10] sm:$0xff]  ;;  %v2508_v21 = vld [vmem:[#allocation2 + $0x8] sm:$0xff]  ;;  %v2511_v22 = vld [vmem:[#allocation2] sm:$0xff]  ;;  %v2546_v30 = vsub.s32 4, %v2459_v2  ;;  %s2419_s27 = smov 102   ;;  %vm2420_vm3 = vmmov 0  }
  0x14   :  { %v2470_v7 = vrot.slane %v53_v4, %v64_v3  ;;  %242 = vmatprep.subr.mxu0 %v2482_v11  ;;  %v2539_v25 = vrot.slane %v53_v4, %v101_v24  ;;  %v2550_v31 = vrot.slane %v2474_v8, %v2543_v29  ;;  %v2554_v32 = vrot.slane %v2468_v6, %v2543_v29  ;;  %v2579_v58 = vld [vmem:[%s3159_s2 + $0x30] sm:$0x1f]  ;;  %v2584_v59 = vld [vmem:[%s3159_s2 + $0x28] sm:$0xff]  ;;  %v2594_v60 = vld [vmem:[%s3159_s2 + $0x20] sm:$0xff]  ;;  %s2421_s16 = smov 103   ;;  %s2422_s1 = smov 126  }
  0x15   :  { %243 = vmatpush1.msra.mxu0 %v2486_v13  ;;  %v2558_v33 = vrot.slane %v2474_v8, %v2546_v30  ;;  %v2562_v34 = vrot.slane %v2468_v6, %v2546_v30  ;;  %2055 = vmatpush3.msk.msra.mxu1 %vm213_vm0, %v2579_v58  ;;  %v2601_v61 = vld [vmem:[%s3159_s2 + $0x18] sm:$0xff]  ;;  %v2608_v62 = vld [vmem:[%s3159_s2 + $0x10] sm:$0xff]  ;;  %v2615_v63 = vld [vmem:[%s3159_s2 + $0x8] sm:$0xff]  ;;  %vm209_vm4 = vcmask 416768   ;;  %s2423_s28 = smov 1   ;;  %s2424_s29 = smov 2  }
  0x16   :  { %v66_v12 = vmul.f32 %v2470_v7, %v54_v5  ;;  %244 = vmatprep.subr.mxu0 %v2489_v14  ;;  %2068 = vmatprep.mubr.msk.f32.mxu1 %vm2420_vm3, %v2415_v1  ;;  %v2622_v2 = vld [vmem:[%s3159_s2] sm:$0xff]  ;;  %vm1934_vm13 = vcmask 58368  }
  0x17   :  { %245 = vmatpush1.msra.mxu0 %v2493_v16  ;;  %2056 = vmatprep.subr.mxu1 %v2415_v1 }
  0x18   :  { %v75_v15 = vsel %vm74_vm1, %v66_v12, 0.0  ;;  %246 = vmatprep.subr.mxu0 %v2496_v17  ;;  %2057 = vmatpush3.msra.mxu1 %v2584_v59 }
  0x19   :  { %76 = vadd.xlane.f32.xlu0 %v75_v15  ;;  %247 = vmatpush1.msra.mxu0 %v2499_v18 }
  0x1a   :  { %248 = vmatprep.subr.mxu0 %v2502_v19  ;;  %2058 = vmatprep.subr.mxu1 %v2415_v1 }
  0x1b   :  { %249 = vmatpush1.msra.mxu0 %v2505_v20  ;;  %2059 = vmatpush3.msra.mxu1 %v2594_v60 }
  0x1c   :  { %250 = vmatprep.subr.mxu0 %v2508_v21  ;;  %2060 = vmatprep.subr.mxu1 %v2415_v1 }
  0x1d   :  { %251 = vmatpush1.msra.mxu0 %v2511_v22  ;;  %2061 = vmatpush3.msra.mxu1 %v2601_v61 }
  0x1e   :  { %285 = vmatmul.mubr.f32.vlgmr.msra.gmra.mxu0 %v2415_v1  ;;  %1955 = vmatprep.subr.msk.mxu0 %vm213_vm0, %v2468_v6 }
  0x1f   :  { %1956 = vmatpush1.msk.msra.mxu0 %vm213_vm0, %v2474_v8  ;;  %507 = vmatprep.mubr.f32.mxu0 %v2415_v1 }
  0x20   :  { %463 = vmatprep.subr.mxu0 %v2476_v9  ;;  %2062 = vmatprep.subr.mxu1 %v2415_v1 }
  0x21   :  { %464 = vmatpush1.msra.mxu0 %v2478_v10  ;;  %2063 = vmatpush3.msra.mxu1 %v2608_v62 }
  0x22   :  { %465 = vmatprep.subr.mxu0 %v2482_v11  ;;  %2064 = vmatprep.subr.mxu1 %v2415_v1 }
  0x23   :  { %466 = vmatpush1.msra.mxu0 %v2486_v13  ;;  %2065 = vmatpush3.msra.mxu1 %v2615_v63 }
  0x24   :  { %467 = vmatprep.subr.mxu0 %v2489_v14  ;;  %2066 = vmatprep.subr.mxu1 %v2415_v1 }
  0x25   :  { %468 = vmatpush1.msra.mxu0 %v2493_v16  ;;  %2067 = vmatpush3.msra.mxu1 %v2622_v2 }
  0x26   :  { %469 = vmatprep.subr.mxu0 %v2496_v17  ;;  %2071 = vmatprep.subr.mxu1 %v2415_v1 }
  0x27   :  { %470 = vmatpush1.msra.mxu0 %v2499_v18 }
  0x28   :  { %471 = vmatprep.subr.mxu0 %v2502_v19 }
  0x29   :  { %472 = vmatpush1.msra.mxu0 %v2505_v20 }
  0x2a   :  { %473 = vmatprep.subr.mxu0 %v2508_v21 }
  0x2b   :  { %474 = vmatpush1.msra.mxu0 %v2511_v22 }
  0x2c   :  { %1960 = vmatprep.subr.msk.mxu0 %vm213_vm0, %v2468_v6 }
  0xa2   :  { %v77_v26 = vpop.xlane.xlu0 %76 }
  0xa3   :  { %v103_v27 = vadd.f32 %v2539_v25, %v77_v26  ;;  %v55_v26 = vld [vmem:[%s3157_s0 + $0x2] sm:$0x3] }
  0xa5   :  { %v111_v28 = vmax.f32 %v103_v27, 0.0  ;;  %v67_v27 = vmul.f32 %v2470_v7, %v55_v26 }
  0xa7   :  { %121 = vperm.xlu0 %2210, %v111_v28   ;;  %v78_v28 = vsel %vm74_vm1, %v67_v27, 0.0 }
  0xde   :  { %v286_v36 = vpop.f32.mrf.mxu0 }
  0xe0   :  { %v288_v41 = vpop.f32.mrf.mxu0 }
 0x122   :  { %v122_v35 = vpop.permute.xlu0 %121 }
 0x123   :  { %v167_v37 = vmul.f32 %v2550_v31, %v122_v35  ;;  %v168_v38 = vmul.f32 %v2554_v32, %v122_v35 }
 0x125   :  { %v191_v39 = vadd.f32 %v2558_v33, %v167_v37  ;;  %v192_v40 = vadd.f32 %v2562_v34, %v168_v38 }
 0x127   :  { %v291_v42 = vadd.f32 %v286_v36, %v191_v39  ;;  %v292_v43 = vadd.f32 %v288_v41, %v192_v40 }
 0x129   :  { %2218 = vtanh.f32 %v291_v42  ;;  %v293_v46 = vmul.f32 0.5, %v291_v42  ;;  %v299_v3 = vmul.f32 0.5, %v292_v43 }
 0x12a   :  { %2220 = vtanh.f32 %v292_v43 }
 0x12b   :  { %2222 = vtanh.f32 %v293_v46 }
 0x136   :  { %v2219_v44 = vpop.eup %2218 }
 0x137   :  { %306 = vrot.lane.b32.xlu1 %v2219_v44, %s2417_s25  ;;  %v2221_v45 = vpop.eup %2220 }
 0x138   :  { %v2223_v47 = vpop.eup %2222 }
 0x139   :  { %v295_v49 = vadd.f32 1.0, %v2223_v47 }
 0x13b   :  { %308 = vrot.lane.b32.xlu1 %v2221_v45, %s2417_s25  ;;  %v296_v50 = vmul.f32 0.5, %v295_v49 }
 0x13d   :  { %v303_v54 = vmul.f32 0.0, %v296_v50 }
 0x1a9   :  { %v307_v48 = vpop.permute.xlu1 %306 }
 0x1ad   :  { %v309_v51 = vpop.permute.xlu1 %308 }
 0x1ae   :  { %v311_v52 = vsel %vm310_vm2, %v307_v48, %v309_v51 }
 0x1af   :  { %v313_v53 = vmul.f32 %v311_v52, %v296_v50 }
 0x1b1   :  { %315 = vrot.lane.b32.xlu1 %v313_v53, %s2418_s26 }
 0x223   :  { %v316_v55 = vpop.permute.xlu1 %315 }
 0x224   :  { %v2572_v56 = vadd.f32 %v316_v55, %v303_v54 }
 0x226   :  { %2224 = vtanh.f32 %v2572_v56 }
 0x227   :  { %2226 = vtanh.f32 %v299_v3 }
 0x233   :  { %v2225_v57 = vpop.eup %2224 }
 0x234   :  { %321 = vrot.lane.b32.xlu1 %v2225_v57, %s2419_s27  ;;  %v2227_v4 = vpop.eup %2226 }
 0x235   :  { %v301_v5 = vadd.f32 1.0, %v2227_v4 }
 0x237   :  { %v302_v12 = vmul.f32 0.5, %v301_v5 }
 0x2a6   :  { %v322_v15 = vpop.permute.xlu1 %321 }
 0x2a7   :  { %v324_v24 = vmul.f32 %v322_v15, %v302_v12 }
 0x2a9   :  { %331 = vrot.lane.b32.xlu1 %v324_v24, %s2421_s16 }
 0x2cd   :  { %79 = vadd.xlane.f32.xlu1 %v78_v28 }
 0x31b   :  { %v332_v35 = vpop.permute.xlu1 %331 }
 0x31c   :  { %2069 = vmatmul.mubr.msk.f32.vlgmr.msra.gmra.mxu1 %vm209_vm4, %v332_v35  ;;  %1957 = vmatmul.mubr.msk.f32.vlgmr.msra.gmra.mxu0 %vm209_vm4, %v332_v35 }
 0x31d   :  { %2072 = vmatpush3.msk.msra.mxu1 %vm213_vm0, %v2579_v58  ;;  %1961 = vmatpush1.msk.msra.mxu0 %vm213_vm0, %v2474_v8 }
 0x31e   :  { %2073 = vmatprep.subr.mxu1 %v2415_v1  ;;  %674 = vmatprep.subr.mxu0 %v2476_v9 }
 0x31f   :  { %2074 = vmatpush3.msra.mxu1 %v2584_v59  ;;  %675 = vmatpush1.msra.mxu0 %v2478_v10 }
 0x320   :  { %2075 = vmatprep.subr.mxu1 %v2415_v1  ;;  %676 = vmatprep.subr.mxu0 %v2482_v11 }
 0x321   :  { %2076 = vmatpush3.msra.mxu1 %v2594_v60  ;;  %677 = vmatpush1.msra.mxu0 %v2486_v13 }
 0x322   :  { %2077 = vmatprep.subr.mxu1 %v2415_v1  ;;  %678 = vmatprep.subr.mxu0 %v2489_v14 }
 0x323   :  { %2078 = vmatpush3.msra.mxu1 %v2601_v61  ;;  %679 = vmatpush1.msra.mxu0 %v2493_v16 }
 0x324   :  { %2079 = vmatprep.subr.mxu1 %v2415_v1  ;;  %680 = vmatprep.subr.mxu0 %v2496_v17 }
 0x325   :  { %2080 = vmatpush3.msra.mxu1 %v2608_v62  ;;  %681 = vmatpush1.msra.mxu0 %v2499_v18 }
 0x326   :  { %2081 = vmatprep.subr.mxu1 %v2415_v1  ;;  %682 = vmatprep.subr.mxu0 %v2502_v19 }
 0x327   :  { %2082 = vmatpush3.msra.mxu1 %v2615_v63  ;;  %683 = vmatpush1.msra.mxu0 %v2505_v20 }
 0x328   :  { %2083 = vmatprep.subr.mxu1 %v2415_v1  ;;  %684 = vmatprep.subr.mxu0 %v2508_v21 }
 0x329   :  { %2084 = vmatpush3.msra.mxu1 %v2622_v2  ;;  %2085 = vmatprep.mubr.msk.f32.mxu1 %vm2420_vm3, %v2415_v1 }
 0x32a   :  { %685 = vmatpush1.msra.mxu0 %v2511_v22  ;;  %718 = vmatprep.mubr.f32.mxu0 %v2415_v1 }
 0x32b   :  { %2088 = vmatprep.subr.mxu1 %v2415_v1  ;;  %1965 = vmatprep.subr.msk.mxu0 %vm213_vm0, %v2468_v6 }
 0x356   :  { %v80_v36 = vpop.xlane.xlu1 %79 }
 0x357   :  { %v104_v37 = vadd.f32 %v2539_v25, %v80_v36 }
 0x359   :  { %v112_v38 = vmax.f32 %v104_v37, 0.0 }
 0x35b   :  { %126 = vperm.xlu0 %2210, %v112_v38  }
 0x3d6   :  { %v127_v39 = vpop.permute.xlu0 %126 }
 0x3d7   :  { %v169_v40 = vmul.f32 %v2550_v31, %v127_v39  ;;  %v170_v41 = vmul.f32 %v2554_v32, %v127_v39 }
 0x3d9   :  { %v193_v42 = vadd.f32 %v2558_v33, %v169_v40  ;;  %v194_v47 = vadd.f32 %v2562_v34, %v170_v41 }
 0x3dc   :  { %v2674_v43 = vpop.f32.mrf.mxu1  ;;  %v509_v44 = vpop.f32.mrf.mxu0 }
 0x3dd   :  { %v514_v45 = vadd.f32 %v509_v44, %v193_v42 }
 0x3de   :  { %v2070_v46 = vpop.f32.mrf.mxu1  ;;  %v511_v48 = vpop.f32.mrf.mxu0 }
 0x3df   :  { %2228 = vtanh.f32 %v514_v45  ;;  %v515_v49 = vadd.f32 %v511_v48, %v194_v47  ;;  %v516_v52 = vmul.f32 0.5, %v514_v45 }
 0x3e1   :  { %2230 = vtanh.f32 %v515_v49  ;;  %v522_v27 = vmul.f32 0.5, %v515_v49 }
 0x3e2   :  { %2232 = vtanh.f32 %v516_v52 }
 0x3ec   :  { %v2229_v50 = vpop.eup %2228 }
 0x3ed   :  { %529 = vrot.lane.b32.xlu0 %v2229_v50, %s2417_s25 }
 0x3ee   :  { %v2231_v51 = vpop.eup %2230 }
 0x3ef   :  { %v2233_v53 = vpop.eup %2232 }
 0x3f0   :  { %v518_v55 = vadd.f32 1.0, %v2233_v53 }
 0x3f1   :  { %531 = vrot.lane.b32.xlu0 %v2231_v51, %s2417_s25 }
 0x3f2   :  { %v519_v3 = vmul.f32 0.5, %v518_v55 }
 0x3f4   :  { %v526_v12 = vmul.f32 %v519_v3, %v2572_v56  ;;  %v56_v56 = vld [vmem:[%s3157_s0 + $0x4] sm:$0x3] }
 0x3f5   :  { %v68_v39 = vmul.f32 %v2470_v7, %v56_v56 }
 0x3f7   :  { %v81_v40 = vsel %vm74_vm1, %v68_v39, 0.0 }
 0x45f   :  { %v530_v54 = vpop.permute.xlu0 %529 }
 0x463   :  { %v532_v57 = vpop.permute.xlu0 %531 }
 0x464   :  { %v533_v4 = vsel %vm310_vm2, %v530_v54, %v532_v57 }
 0x465   :  { %v535_v5 = vmul.f32 %v533_v4, %v519_v3 }
 0x467   :  { %537 = vrot.lane.b32.xlu1 %v535_v5, %s2418_s26 }
 0x4d9   :  { %v538_v15 = vpop.permute.xlu1 %537 }
 0x4da   :  { %v2682_v24 = vadd.f32 %v538_v15, %v526_v12 }
 0x4dc   :  { %2234 = vtanh.f32 %v2682_v24 }
 0x4dd   :  { %2236 = vtanh.f32 %v522_v27 }
 0x4e9   :  { %v2235_v26 = vpop.eup %2234 }
 0x4ea   :  { %543 = vrot.lane.b32.xlu0 %v2235_v26, %s2419_s27  ;;  %v2237_v28 = vpop.eup %2236 }
 0x4eb   :  { %v524_v35 = vadd.f32 1.0, %v2237_v28 }
 0x4ed   :  { %v525_v36 = vmul.f32 0.5, %v524_v35 }
 0x55c   :  { %v544_v37 = vpop.permute.xlu0 %543 }
 0x55d   :  { %v546_v38 = vmul.f32 %v544_v37, %v525_v36 }
 0x55f   :  { %549 = vrot.lane.b32.xlu0 %v546_v38, %s2421_s16 }
 0x57e   :  { %82 = vadd.xlane.f32.xlu0 %v81_v40 }
 0x5d1   :  { %v550_v41 = vpop.permute.xlu0 %549 }
 0x5d2   :  { %2086 = vmatmul.mubr.msk.f32.vlgmr.msra.gmra.mxu1 %vm209_vm4, %v550_v41  ;;  %1962 = vmatmul.mubr.msk.f32.vlgmr.msra.gmra.mxu0 %vm209_vm4, %v550_v41 }
 0x5d3   :  { %2089 = vmatpush3.msk.msra.mxu1 %vm213_vm0, %v2579_v58  ;;  %1966 = vmatpush1.msk.msra.mxu0 %vm213_vm0, %v2474_v8 }
 0x5d4   :  { %2090 = vmatprep.subr.mxu1 %v2415_v1  ;;  %885 = vmatprep.subr.mxu0 %v2476_v9 }
 0x5d5   :  { %2091 = vmatpush3.msra.mxu1 %v2584_v59  ;;  %886 = vmatpush1.msra.mxu0 %v2478_v10 }
 0x5d6   :  { %2092 = vmatprep.subr.mxu1 %v2415_v1  ;;  %887 = vmatprep.subr.mxu0 %v2482_v11 }
 0x5d7   :  { %2093 = vmatpush3.msra.mxu1 %v2594_v60  ;;  %888 = vmatpush1.msra.mxu0 %v2486_v13 }
 0x5d8   :  { %2094 = vmatprep.subr.mxu1 %v2415_v1  ;;  %889 = vmatprep.subr.mxu0 %v2489_v14 }
 0x5d9   :  { %2095 = vmatpush3.msra.mxu1 %v2601_v61  ;;  %890 = vmatpush1.msra.mxu0 %v2493_v16 }
 0x5da   :  { %2096 = vmatprep.subr.mxu1 %v2415_v1  ;;  %891 = vmatprep.subr.mxu0 %v2496_v17 }
 0x5db   :  { %2097 = vmatpush3.msra.mxu1 %v2608_v62  ;;  %892 = vmatpush1.msra.mxu0 %v2499_v18 }
 0x5dc   :  { %2098 = vmatprep.subr.mxu1 %v2415_v1  ;;  %893 = vmatprep.subr.mxu0 %v2502_v19 }
 0x5dd   :  { %2099 = vmatpush3.msra.mxu1 %v2615_v63  ;;  %894 = vmatpush1.msra.mxu0 %v2505_v20 }
 0x5de   :  { %2100 = vmatprep.subr.mxu1 %v2415_v1  ;;  %895 = vmatprep.subr.mxu0 %v2508_v21 }
 0x5df   :  { %2101 = vmatpush3.msra.mxu1 %v2622_v2  ;;  %2102 = vmatprep.mubr.msk.f32.mxu1 %vm2420_vm3, %v2415_v1 }
 0x5e0   :  { %896 = vmatpush1.msra.mxu0 %v2511_v22  ;;  %929 = vmatprep.mubr.f32.mxu0 %v2415_v1 }
 0x5e1   :  { %2105 = vmatprep.subr.mxu1 %v2415_v1  ;;  %1970 = vmatprep.subr.msk.mxu0 %vm213_vm0, %v2468_v6 }
 0x607   :  { %v83_v42 = vpop.xlane.xlu0 %82 }
 0x608   :  { %v105_v44 = vadd.f32 %v2539_v25, %v83_v42 }
 0x60a   :  { %v113_v45 = vmax.f32 %v105_v44, 0.0 }
 0x60c   :  { %131 = vperm.xlu1 %2211, %v113_v45  }
 0x687   :  { %v132_v46 = vpop.permute.xlu1 %131 }
 0x688   :  { %v171_v47 = vmul.f32 %v2550_v31, %v132_v46  ;;  %v172_v48 = vmul.f32 %v2554_v32, %v132_v46 }
 0x68a   :  { %v195_v49 = vadd.f32 %v2558_v33, %v171_v47  ;;  %v196_v53 = vadd.f32 %v2562_v34, %v172_v48 }
 0x692   :  { %v2732_v50 = vpop.f32.mrf.mxu1  ;;  %v720_v51 = vpop.f32.mrf.mxu0 }
 0x693   :  { %v725_v52 = vadd.f32 %v720_v51, %v195_v49 }
 0x694   :  { %v2087_v54 = vpop.f32.mrf.mxu1  ;;  %v722_v55 = vpop.f32.mrf.mxu0 }
 0x695   :  { %2238 = vtanh.f32 %v725_v52  ;;  %v726_v57 = vadd.f32 %v722_v55, %v196_v53  ;;  %v727_v5 = vmul.f32 0.5, %v725_v52 }
 0x697   :  { %2240 = vtanh.f32 %v726_v57  ;;  %v733_v40 = vmul.f32 0.5, %v726_v57 }
 0x698   :  { %2242 = vtanh.f32 %v727_v5 }
 0x6a2   :  { %v2239_v3 = vpop.eup %2238 }
 0x6a3   :  { %740 = vrot.lane.b32.xlu1 %v2239_v3, %s2417_s25 }
 0x6a4   :  { %v2241_v4 = vpop.eup %2240 }
 0x6a5   :  { %v2243_v12 = vpop.eup %2242 }
 0x6a6   :  { %v729_v26 = vadd.f32 1.0, %v2243_v12 }
 0x6a7   :  { %742 = vrot.lane.b32.xlu1 %v2241_v4, %s2417_s25 }
 0x6a8   :  { %v730_v28 = vmul.f32 0.5, %v729_v26 }
 0x6aa   :  { %v737_v37 = vmul.f32 %v730_v28, %v2682_v24  ;;  %v57_v24 = vld [vmem:[%s3157_s0 + $0x6] sm:$0x3] }
 0x6ab   :  { %v69_v47 = vmul.f32 %v2470_v7, %v57_v24 }
 0x6ad   :  { %v84_v48 = vsel %vm74_vm1, %v69_v47, 0.0 }
 0x715   :  { %v741_v15 = vpop.permute.xlu1 %740 }
 0x719   :  { %v743_v27 = vpop.permute.xlu1 %742 }
 0x71a   :  { %v744_v35 = vsel %vm310_vm2, %v741_v15, %v743_v27 }
 0x71b   :  { %v746_v36 = vmul.f32 %v744_v35, %v730_v28 }
 0x71d   :  { %748 = vrot.lane.b32.xlu1 %v746_v36, %s2418_s26 }
 0x78f   :  { %v749_v38 = vpop.permute.xlu1 %748 }
 0x790   :  { %v2740_v56 = vadd.f32 %v749_v38, %v737_v37 }
 0x792   :  { %2244 = vtanh.f32 %v2740_v56 }
 0x793   :  { %2246 = vtanh.f32 %v733_v40 }
 0x79f   :  { %v2245_v39 = vpop.eup %2244 }
 0x7a0   :  { %754 = vrot.lane.b32.xlu1 %v2245_v39, %s2419_s27  ;;  %v2247_v41 = vpop.eup %2246 }
 0x7a1   :  { %v735_v42 = vadd.f32 1.0, %v2247_v41 }
 0x7a3   :  { %v736_v44 = vmul.f32 0.5, %v735_v42 }
 0x812   :  { %v755_v45 = vpop.permute.xlu1 %754 }
 0x813   :  { %v757_v46 = vmul.f32 %v755_v45, %v736_v44 }
 0x815   :  { %760 = vrot.lane.b32.xlu1 %v757_v46, %s2421_s16 }
 0x839   :  { %85 = vadd.xlane.f32.xlu1 %v84_v48 }
 0x887   :  { %v761_v49 = vpop.permute.xlu1 %760 }
 0x888   :  { %2103 = vmatmul.mubr.msk.f32.vlgmr.msra.gmra.mxu1 %vm209_vm4, %v761_v49  ;;  %1967 = vmatmul.mubr.msk.f32.vlgmr.msra.gmra.mxu0 %vm209_vm4, %v761_v49  ;;  %v58_v49 = vld [vmem:[%s3157_s0 + $0x8] sm:$0x3] }
 0x889   :  { %2106 = vmatpush3.msk.msra.mxu1 %vm213_vm0, %v2579_v58  ;;  %1971 = vmatpush1.msk.msra.mxu0 %vm213_vm0, %v2474_v8 }
 0x88a   :  { %2107 = vmatprep.subr.mxu1 %v2415_v1  ;;  %1096 = vmatprep.subr.mxu0 %v2476_v9 }
 0x88b   :  { %2108 = vmatpush3.msra.mxu1 %v2584_v59  ;;  %1097 = vmatpush1.msra.mxu0 %v2478_v10 }
 0x88c   :  { %2109 = vmatprep.subr.mxu1 %v2415_v1  ;;  %1098 = vmatprep.subr.mxu0 %v2482_v11 }
 0x88d   :  { %2110 = vmatpush3.msra.mxu1 %v2594_v60  ;;  %1099 = vmatpush1.msra.mxu0 %v2486_v13 }
 0x88e   :  { %2111 = vmatprep.subr.mxu1 %v2415_v1  ;;  %1100 = vmatprep.subr.mxu0 %v2489_v14 }
 0x88f   :  { %2112 = vmatpush3.msra.mxu1 %v2601_v61  ;;  %1101 = vmatpush1.msra.mxu0 %v2493_v16 }
 0x890   :  { %2113 = vmatprep.subr.mxu1 %v2415_v1  ;;  %1102 = vmatprep.subr.mxu0 %v2496_v17 }
 0x891   :  { %2114 = vmatpush3.msra.mxu1 %v2608_v62  ;;  %1103 = vmatpush1.msra.mxu0 %v2499_v18 }
 0x892   :  { %2115 = vmatprep.subr.mxu1 %v2415_v1  ;;  %1104 = vmatprep.subr.mxu0 %v2502_v19 }
 0x893   :  { %2116 = vmatpush3.msra.mxu1 %v2615_v63  ;;  %1105 = vmatpush1.msra.mxu0 %v2505_v20 }
 0x894   :  { %2117 = vmatprep.subr.mxu1 %v2415_v1  ;;  %1106 = vmatprep.subr.mxu0 %v2508_v21 }
 0x895   :  { %2118 = vmatpush3.msra.mxu1 %v2622_v2  ;;  %2119 = vmatprep.mubr.msk.f32.mxu1 %vm2420_vm3, %v2415_v1 }
 0x896   :  { %1107 = vmatpush1.msra.mxu0 %v2511_v22  ;;  %1140 = vmatprep.mubr.f32.mxu0 %v2415_v1 }
 0x897   :  { %2122 = vmatprep.subr.mxu1 %v2415_v1  ;;  %1975 = vmatprep.subr.msk.mxu0 %vm213_vm0, %v2468_v6 }
 0x8c2   :  { %v86_v51 = vpop.xlane.xlu1 %85 }
 0x8c3   :  { %v106_v52 = vadd.f32 %v2539_v25, %v86_v51  ;;  %v70_v51 = vmul.f32 %v2470_v7, %v58_v49 }
 0x8c5   :  { %v114_v53 = vmax.f32 %v106_v52, 0.0  ;;  %v87_v52 = vsel %vm74_vm1, %v70_v51, 0.0 }
 0x8c7   :  { %136 = vperm.xlu0 %2210, %v114_v53  }
 0x942   :  { %v137_v54 = vpop.permute.xlu0 %136 }
 0x943   :  { %v173_v55 = vmul.f32 %v2550_v31, %v137_v54  ;;  %v174_v57 = vmul.f32 %v2554_v32, %v137_v54 }
 0x945   :  { %v197_v3 = vadd.f32 %v2558_v33, %v173_v55  ;;  %v198_v15 = vadd.f32 %v2562_v34, %v174_v57 }
 0x948   :  { %v2790_v4 = vpop.f32.mrf.mxu1  ;;  %v931_v5 = vpop.f32.mrf.mxu0 }
 0x949   :  { %v936_v12 = vadd.f32 %v931_v5, %v197_v3  ;;  %v2810_v5 = vrot.slane %v2579_v58, %v2543_v29 }
 0x94a   :  { %v2104_v26 = vpop.f32.mrf.mxu1  ;;  %v933_v27 = vpop.f32.mrf.mxu0 }
 0x94b   :  { %2248 = vtanh.f32 %v936_v12  ;;  %v937_v28 = vadd.f32 %v933_v27, %v198_v15  ;;  %v938_v37 = vmul.f32 0.5, %v936_v12  ;;  %v329_v12 = vmul.f32 0.0, %v2810_v5 }
 0x94c   :  { %v2816_v26 = vrot.slane %v2579_v58, %v2546_v30 }
 0x94d   :  { %2250 = vtanh.f32 %v937_v28  ;;  %v944_v53 = vmul.f32 0.5, %v937_v28  ;;  %v405_v15 = vadd.f32 %v2674_v43, %v329_v12 }
 0x94e   :  { %2252 = vtanh.f32 %v938_v37 }
 0x94f   :  { %v412_v27 = vadd.f32 %v2816_v26, %v405_v15 }
 0x958   :  { %v2249_v35 = vpop.eup %2248 }
 0x959   :  { %951 = vrot.lane.b32.xlu0 %v2249_v35, %s2417_s25 }
 0x95a   :  { %v2251_v36 = vpop.eup %2250 }
 0x95b   :  { %v2253_v38 = vpop.eup %2252 }
 0x95c   :  { %v940_v40 = vadd.f32 1.0, %v2253_v38 }
 0x95d   :  { %953 = vrot.lane.b32.xlu0 %v2251_v36, %s2417_s25 }
 0x95e   :  { %v941_v42 = vmul.f32 0.5, %v940_v40 }
 0x960   :  { %v948_v46 = vmul.f32 %v941_v42, %v2740_v56 }
 0x9cb   :  { %v952_v39 = vpop.permute.xlu0 %951 }
 0x9cf   :  { %v954_v41 = vpop.permute.xlu0 %953 }
 0x9d0   :  { %v955_v44 = vsel %vm310_vm2, %v952_v39, %v954_v41 }
 0x9d1   :  { %v957_v45 = vmul.f32 %v955_v44, %v941_v42 }
 0x9d3   :  { %959 = vrot.lane.b32.xlu0 %v957_v45, %s2418_s26 }
 0xa45   :  { %v960_v24 = vpop.permute.xlu0 %959 }
 0xa46   :  { %v2798_v47 = vadd.f32 %v960_v24, %v948_v46 }
 0xa48   :  { %2254 = vtanh.f32 %v2798_v47 }
 0xa49   :  { %2256 = vtanh.f32 %v944_v53 }
 0xa4a   :  { %2258 = vtanh.f32 %v412_v27 }
 0xa55   :  { %v2255_v48 = vpop.eup %2254 }
 0xa56   :  { %965 = vrot.lane.b32.xlu0 %v2255_v48, %s2419_s27  ;;  %v2257_v56 = vpop.eup %2256 }
 0xa57   :  { %v946_v54 = vadd.f32 1.0, %v2257_v56  ;;  %v2259_v37 = vpop.eup %2258 }
 0xa59   :  { %v947_v55 = vmul.f32 0.5, %v946_v54  ;;  %v2425_v54 = vmov 3  }
 0xa75   :  { %88 = vadd.xlane.f32.xlu0 %v87_v52 }
 0xac8   :  { %v966_v57 = vpop.permute.xlu0 %965 }
 0xac9   :  { %v968_v3 = vmul.f32 %v966_v57, %v947_v55 }
 0xacb   :  { %971 = vrot.lane.b32.xlu1 %v968_v3, %s2421_s16 }
 0xafe   :  { %v89_v28 = vpop.xlane.xlu0 %88 }
 0xaff   :  { %v107_v35 = vadd.f32 %v2539_v25, %v89_v28 }
 0xb01   :  { %v115_v36 = vmax.f32 %v107_v35, 0.0 }
 0xb03   :  { %141 = vperm.xlu1 %2211, %v115_v36  }
 0xb07   :  { %420 = vrot.lane.b32.xlu1 %v2259_v37, %s2422_s1 }
 0xb08   :  { %2212 = vset.pattern.permute.xlu1 %v2425_v54 }
 0xb3d   :  { %v972_v29 = vpop.permute.xlu1 %971 }
 0xb3e   :  { %2120 = vmatmul.mubr.msk.f32.vlgmr.msra.gmra.mxu1 %vm209_vm4, %v972_v29  ;;  %1972 = vmatmul.mubr.msk.f32.vlgmr.msra.gmra.mxu0 %vm209_vm4, %v972_v29 }
 0xb3f   :  { %2123 = vmatpush3.msk.msra.mxu1 %vm213_vm0, %v2579_v58  ;;  %1976 = vmatpush1.msk.msra.mxu0 %vm213_vm0, %v2474_v8 }
 0xb40   :  { %2124 = vmatprep.subr.mxu1 %v2415_v1  ;;  %1307 = vmatprep.subr.mxu0 %v2476_v9  ;;  %v413_v9 = vmul.f32 0.5, %v412_v27 }
 0xb41   :  { %2125 = vmatpush3.msra.mxu1 %v2584_v59  ;;  %1308 = vmatpush1.msra.mxu0 %v2478_v10 }
 0xb42   :  { %2126 = vmatprep.subr.mxu1 %v2415_v1  ;;  %1309 = vmatprep.subr.mxu0 %v2482_v11  ;;  %2260 = vtanh.f32 %v413_v9 }
 0xb43   :  { %2127 = vmatpush3.msra.mxu1 %v2594_v60  ;;  %1310 = vmatpush1.msra.mxu0 %v2486_v13 }
 0xb44   :  { %2128 = vmatprep.subr.mxu1 %v2415_v1  ;;  %1311 = vmatprep.subr.mxu0 %v2489_v14 }
 0xb45   :  { %2129 = vmatpush3.msra.mxu1 %v2601_v61  ;;  %1312 = vmatpush1.msra.mxu0 %v2493_v16 }
 0xb46   :  { %2130 = vmatprep.subr.mxu1 %v2415_v1  ;;  %1313 = vmatprep.subr.mxu0 %v2496_v17 }
 0xb47   :  { %2131 = vmatpush3.msra.mxu1 %v2608_v62  ;;  %1314 = vmatpush1.msra.mxu0 %v2499_v18 }
 0xb48   :  { %2132 = vmatprep.subr.mxu1 %v2415_v1  ;;  %1315 = vmatprep.subr.mxu0 %v2502_v19 }
 0xb49   :  { %2133 = vmatpush3.msra.mxu1 %v2615_v63  ;;  %1316 = vmatpush1.msra.mxu0 %v2505_v20 }
 0xb4a   :  { %2134 = vmatprep.subr.mxu1 %v2415_v1  ;;  %1317 = vmatprep.subr.mxu0 %v2508_v21 }
 0xb4b   :  { %2135 = vmatpush3.msra.mxu1 %v2622_v2  ;;  %2136 = vmatprep.mubr.msk.f32.mxu1 %vm2420_vm3, %v2415_v1 }
 0xb4c   :  { %1318 = vmatpush1.msra.mxu0 %v2511_v22  ;;  %1351 = vmatprep.mubr.f32.mxu0 %v2415_v1 }
 0xb4d   :  { %2139 = vmatprep.subr.mxu1 %v2415_v1  ;;  %1980 = vmatprep.subr.msk.mxu0 %vm213_vm0, %v2468_v6 }
 0xb4f   :  { %v2261_v10 = vpop.eup %2260 }
 0xb50   :  { %v415_v11 = vadd.f32 1.0, %v2261_v10 }
 0xb52   :  { %v416_v43 = vmul.f32 0.5, %v415_v11 }
 0xb54   :  { %v418_v40 = vmul.f32 0.0, %v416_v43 }
 0xb7e   :  { %v142_v30 = vpop.permute.xlu1 %141 }
 0xb7f   :  { %v175_v44 = vmul.f32 %v2550_v31, %v142_v30  ;;  %v176_v6 = vmul.f32 %v2554_v32, %v142_v30 }
 0xb81   :  { %v199_v45 = vadd.f32 %v2558_v33, %v175_v44  ;;  %v200_v49 = vadd.f32 %v2562_v34, %v176_v6 }
 0xb82   :  { %v421_v38 = vpop.permute.xlu1 %420 }
 0xb83   :  { %v423_v39 = vmul.f32 %v421_v38, %v416_v43 }
 0xb85   :  { %425 = vrot.lane.b32.xlu1 %v423_v39, %s2423_s28 }
 0xbf7   :  { %v426_v41 = vpop.permute.xlu1 %425 }
 0xbf8   :  { %v2858_v42 = vadd.f32 %v426_v41, %v418_v40 }
 0xbfa   :  { %2262 = vtanh.f32 %v2858_v42 }
 0xbfe   :  { %v2864_v46 = vpop.f32.mrf.mxu1  ;;  %v1142_v24 = vpop.f32.mrf.mxu0 }
 0xbff   :  { %v1147_v48 = vadd.f32 %v1142_v24, %v199_v45 }
 0xc00   :  { %v2121_v51 = vpop.f32.mrf.mxu1  ;;  %v1144_v52 = vpop.f32.mrf.mxu0 }
 0xc01   :  { %2264 = vtanh.f32 %v1147_v48  ;;  %v1148_v53 = vadd.f32 %v1144_v52, %v200_v49  ;;  %v1149_v3 = vmul.f32 0.5, %v1147_v48 }
 0xc03   :  { %2266 = vtanh.f32 %v1148_v53 }
 0xc04   :  { %2268 = vtanh.f32 %v1149_v3 }
 0xc07   :  { %v2263_v56 = vpop.eup %2262 }
 0xc08   :  { %431 = vrot.lane.b32.xlu0 %v2263_v56, %s2424_s29 }
 0xc0e   :  { %v2265_v55 = vpop.eup %2264 }
 0xc0f   :  { %1162 = vrot.lane.b32.xlu1 %v2265_v55, %s2417_s25 }
 0xc10   :  { %v2267_v57 = vpop.eup %2266 }
 0xc11   :  { %v2269_v12 = vpop.eup %2268 }
 0xc12   :  { %v1151_v27 = vadd.f32 1.0, %v2269_v12 }
 0xc13   :  { %1164 = vrot.lane.b32.xlu1 %v2267_v57, %s2417_s25 }
 0xc14   :  { %v1152_v28 = vmul.f32 0.5, %v1151_v27  ;;  %v2899_v27 = vld [vmem:[#allocation2 + $0x58] sm:$0xff] }
 0xc16   :  { %v1159_v10 = vmul.f32 %v1152_v28, %v2798_v47  ;;  %v1155_v47 = vmul.f32 0.5, %v1148_v53  ;;  %v59_v53 = vld [vmem:[%s3157_s0 + $0xa] sm:$0x3] }
 0xc17   :  { %v71_v3 = vmul.f32 %v2470_v7, %v59_v53 }
 0xc19   :  { %v90_v12 = vsel %vm74_vm1, %v71_v3, 0.0 }
 0xc7a   :  { %v432_v29 = vpop.permute.xlu0 %431 }
 0xc7b   :  { %v434_v9 = vmul.f32 %v432_v29, %v416_v43 }
 0xc81   :  { %v1163_v15 = vpop.permute.xlu1 %1162 }
 0xc85   :  { %v1165_v35 = vpop.permute.xlu1 %1164 }
 0xc86   :  { %v1166_v36 = vsel %vm310_vm2, %v1163_v15, %v1165_v35  ;;  %v2907_v35 = vld [vmem:[#allocation2 + $0x48] sm:$0xff] }
 0xc87   :  { %v1168_v37 = vmul.f32 %v1166_v36, %v1152_v28  ;;  %v2903_v28 = vld [vmem:[#allocation2 + $0x50] sm:$0xff] }
 0xc89   :  { %1170 = vrot.lane.b32.xlu1 %v1168_v37, %s2418_s26 }
 0xc8d   :  { %438 = vperm.xlu1 %2212, %v434_v9  }
 0xcfb   :  { %v1171_v11 = vpop.permute.xlu1 %1170 }
 0xcfc   :  { %v2874_v30 = vadd.f32 %v1171_v11, %v1159_v10 }
 0xcfe   :  { %2270 = vtanh.f32 %v2874_v30 }
 0xd08   :  { %v2877_v38 = vpop.permute.xlu1 %438 }
 0xd09   :  { %v547_v39 = vmul.f32 %v2877_v38, %v2810_v5 }
 0xd0b   :  { %v2271_v40 = vpop.eup %2270  ;;  %v620_v41 = vadd.f32 %v2732_v50, %v547_v39 }
 0xd0c   :  { %1176 = vrot.lane.b32.xlu1 %v2271_v40, %s2419_s27 }
 0xd0d   :  { %v623_v43 = vadd.f32 %v620_v41, %v2816_v26 }
 0xd0f   :  { %2272 = vtanh.f32 %v623_v43  ;;  %v624_v45 = vmul.f32 0.5, %v623_v43 }
 0xd10   :  { %2274 = vtanh.f32 %v1155_v47 }
 0xd11   :  { %2276 = vtanh.f32 %v624_v45 }
 0xd1c   :  { %v2273_v44 = vpop.eup %2272 }
 0xd1d   :  { %631 = vrot.lane.b32.xlu1 %v2273_v44, %s2422_s1  ;;  %v2275_v6 = vpop.eup %2274 }
 0xd1e   :  { %v1157_v24 = vadd.f32 1.0, %v2275_v6  ;;  %v2277_v50 = vpop.eup %2276 }
 0xd1f   :  { %v626_v52 = vadd.f32 1.0, %v2277_v50 }
 0xd20   :  { %v1158_v48 = vmul.f32 0.5, %v1157_v24 }
 0xd21   :  { %v627_v56 = vmul.f32 0.5, %v626_v52 }
 0xd7e   :  { %v1177_v49 = vpop.permute.xlu1 %1176 }
 0xd7f   :  { %v1179_v51 = vmul.f32 %v1177_v49, %v1158_v48 }
 0xd81   :  { %1182 = vrot.lane.b32.xlu1 %v1179_v51, %s2421_s16 }
 0xd8f   :  { %v632_v55 = vpop.permute.xlu1 %631 }
 0xd90   :  { %v634_v57 = vmul.f32 %v632_v55, %v627_v56 }
 0xd92   :  { %636 = vrot.lane.b32.xlu0 %v634_v57, %s2423_s28 }
 0xda5   :  { %91 = vadd.xlane.f32.xlu1 %v90_v12 }
 0xdf3   :  { %v1183_v15 = vpop.permute.xlu1 %1182 }
 0xdf4   :  { %2137 = vmatmul.mubr.msk.f32.vlgmr.msra.gmra.mxu1 %vm209_vm4, %v1183_v15  ;;  %1977 = vmatmul.mubr.msk.f32.vlgmr.msra.gmra.mxu0 %vm209_vm4, %v1183_v15 }
 0xdf5   :  { %2140 = vmatpush3.msk.msra.mxu1 %vm213_vm0, %v2579_v58  ;;  %1981 = vmatpush1.msk.msra.mxu0 %vm213_vm0, %v2474_v8  ;;  %v629_v8 = vmul.f32 %v627_v56, %v2858_v42 }
 0xdf6   :  { %2141 = vmatprep.subr.mxu1 %v2415_v1  ;;  %1518 = vmatprep.subr.mxu0 %v2899_v27 }
 0xdf7   :  { %2142 = vmatpush3.msra.mxu1 %v2584_v59  ;;  %1519 = vmatpush1.msra.mxu0 %v2903_v28 }
 0xdf8   :  { %2143 = vmatprep.subr.mxu1 %v2415_v1  ;;  %1520 = vmatprep.subr.mxu0 %v2907_v35 }
 0xdf9   :  { %2144 = vmatpush3.msra.mxu1 %v2594_v60  ;;  %1521 = vmatpush1.msra.mxu0 %v2486_v13  ;;  %v2349_v13 = vld [vmem:[#allocation2 + $0x68] sm:$0x1f] }
 0xdfa   :  { %2145 = vmatprep.subr.mxu1 %v2415_v1  ;;  %1522 = vmatprep.subr.mxu0 %v2489_v14 }
 0xdfb   :  { %2146 = vmatpush3.msra.mxu1 %v2601_v61  ;;  %1523 = vmatpush1.msra.mxu0 %v2493_v16 }
 0xdfc   :  { %2147 = vmatprep.subr.mxu1 %v2415_v1  ;;  %1524 = vmatprep.subr.mxu0 %v2496_v17 }
 0xdfd   :  { %2148 = vmatpush3.msra.mxu1 %v2608_v62  ;;  %1525 = vmatpush1.msra.mxu0 %v2499_v18 }
 0xdfe   :  { %2149 = vmatprep.subr.mxu1 %v2415_v1  ;;  %1526 = vmatprep.subr.mxu0 %v2502_v19 }
 0xdff   :  { %2150 = vmatpush3.msra.mxu1 %v2615_v63  ;;  %1527 = vmatpush1.msra.mxu0 %v2505_v20 }
 0xe00   :  { %2151 = vmatprep.subr.mxu1 %v2415_v1  ;;  %1528 = vmatprep.subr.mxu0 %v2508_v21 }
 0xe01   :  { %2152 = vmatpush3.msra.mxu1 %v2622_v2  ;;  %2153 = vmatprep.mubr.msk.f32.mxu1 %vm2420_vm3, %v2415_v1 }
 0xe02   :  { %1529 = vmatpush1.msra.mxu0 %v2511_v22  ;;  %1562 = vmatprep.mubr.f32.mxu0 %v2415_v1 }
 0xe03   :  { %2156 = vmatprep.subr.mxu1 %v2415_v1  ;;  %1985 = vmatprep.subr.msk.mxu0 %vm213_vm0, %v2349_v13 }
 0xe04   :  { %v637_v14 = vpop.permute.xlu0 %636 }
 0xe05   :  { %v639_v16 = vadd.f32 %v637_v14, %v629_v8 }
 0xe07   :  { %2278 = vtanh.f32 %v639_v16 }
 0xe14   :  { %v2279_v17 = vpop.eup %2278 }
 0xe15   :  { %642 = vrot.lane.b32.xlu0 %v2279_v17, %s2424_s29 }
 0xe2e   :  { %v92_v18 = vpop.xlane.xlu1 %91 }
 0xe2f   :  { %v108_v19 = vadd.f32 %v2539_v25, %v92_v18 }
 0xe31   :  { %v116_v20 = vmax.f32 %v108_v19, 0.0 }
 0xe33   :  { %146 = vperm.xlu0 %2210, %v116_v20  }
 0xe37   :  { %2213 = vset.pattern.permute.xlu0 %v2425_v54 }
 0xe87   :  { %v643_v21 = vpop.permute.xlu0 %642 }
 0xe88   :  { %v645_v22 = vmul.f32 %v643_v21, %v627_v56 }
 0xe8a   :  { %649 = vperm.xlu0 %2213, %v645_v22  }
 0xeae   :  { %v147_v58 = vpop.permute.xlu0 %146 }
 0xeaf   :  { %v177_v59 = vmul.f32 %v2550_v31, %v147_v58  ;;  %v178_v60 = vmul.f32 %v2554_v32, %v147_v58 }
 0xeb1   :  { %v201_v61 = vadd.f32 %v2558_v33, %v177_v59  ;;  %v202_v42 = vadd.f32 %v2562_v34, %v178_v60 }
 0xeb4   :  { %v2940_v62 = vpop.f32.mrf.mxu1  ;;  %v1353_v63 = vpop.f32.mrf.mxu0 }
 0xeb5   :  { %v1358_v2 = vadd.f32 %v1353_v63, %v201_v61 }
 0xeb6   :  { %v2138_v36 = vpop.f32.mrf.mxu1  ;;  %v1355_v37 = vpop.f32.mrf.mxu0 }
 0xeb7   :  { %2280 = vtanh.f32 %v1358_v2  ;;  %v1359_v29 = vadd.f32 %v1355_v37, %v202_v42  ;;  %v1360_v44 = vmul.f32 0.5, %v1358_v2  ;;  %v2976_v2 = vld [vmem:[%s3159_s2 + $0x30] sm:$0x1f]  ;;  %v2351_v42 = vld [vmem:[#allocation2 + $0x60] sm:$0x1f]  ;;  %v2986_v36 = vld [vmem:[%s3159_s2 + $0x28] sm:$0xff] }
 0xeb8   :  { %v2995_v37 = vld [vmem:[%s3159_s2 + $0x20] sm:$0xff] }
 0xeb9   :  { %2282 = vtanh.f32 %v1359_v29  ;;  %v1366_v18 = vmul.f32 0.5, %v1359_v29  ;;  %v2355_v29 = vld [vmem:[#allocation2 + $0x38] sm:$0xff] }
 0xec4   :  { %v2281_v9 = vpop.eup %2280 }
 0xec5   :  { %1373 = vrot.lane.b32.xlu0 %v2281_v9, %s2417_s25  ;;  %v2358_v9 = vld [vmem:[#allocation2 + $0x28] sm:$0xff] }
 0xec6   :  { %v2283_v10 = vpop.eup %2282 }
 0xec9   :  { %1375 = vrot.lane.b32.xlu0 %v2283_v10, %s2417_s25  ;;  %v3009_v10 = vld [vmem:[%s3159_s2 + $0x10] sm:$0xff] }
 0xf05   :  { %v2945_v11 = vpop.permute.xlu0 %649 }
 0xf06   :  { %v758_v39 = vmul.f32 %v2945_v11, %v2810_v5 }
 0xf08   :  { %v831_v40 = vadd.f32 %v2790_v4, %v758_v39  ;;  %v2360_v39 = vld [vmem:[#allocation2 + $0x20] sm:$0xff] }
 0xf0a   :  { %v834_v41 = vadd.f32 %v831_v40, %v2816_v26  ;;  %v2361_v40 = vld [vmem:[#allocation2 + $0x18] sm:$0xff] }
 0xf0c   :  { %2284 = vtanh.f32 %v834_v41  ;;  %v835_v50 = vmul.f32 0.5, %v834_v41  ;;  %v3016_v41 = vld [vmem:[%s3159_s2 + $0x8] sm:$0xff] }
 0xf0d   :  { %2286 = vtanh.f32 %v1360_v44  ;;  %v2364_v44 = vld [vmem:[#allocation2 + $0x8] sm:$0xff] }
 0xf0e   :  { %2288 = vtanh.f32 %v835_v50 }
 0xf19   :  { %v2285_v43 = vpop.eup %2284 }
 0xf1a   :  { %842 = vrot.lane.b32.xlu0 %v2285_v43, %s2422_s1  ;;  %v2287_v47 = vpop.eup %2286  ;;  %v2363_v43 = vld [vmem:[#allocation2 + $0x10] sm:$0xff] }
 0xf1b   :  { %v1362_v45 = vadd.f32 1.0, %v2287_v47  ;;  %v2289_v4 = vpop.eup %2288  ;;  %v3023_v47 = vld [vmem:[%s3159_s2] sm:$0xff] }
 0xf1c   :  { %v837_v52 = vadd.f32 1.0, %v2289_v4 }
 0xf1d   :  { %v1363_v24 = vmul.f32 0.5, %v1362_v45 }
 0xf1e   :  { %v838_v56 = vmul.f32 0.5, %v837_v52 }
 0xf1f   :  { %v1370_v53 = vmul.f32 %v1363_v24, %v2874_v30  ;;  %v60_v30 = vld [vmem:[%s3157_s0 + $0xc] sm:$0x3] }
 0xf20   :  { %v840_v8 = vmul.f32 %v838_v56, %v639_v16  ;;  %v72_v19 = vmul.f32 %v2470_v7, %v60_v30 }
 0xf22   :  { %v93_v21 = vsel %vm74_vm1, %v72_v19, 0.0 }
 0xf37   :  { %v1374_v6 = vpop.permute.xlu0 %1373 }
 0xf3b   :  { %v1376_v48 = vpop.permute.xlu0 %1375 }
 0xf3c   :  { %v1377_v49 = vsel %vm310_vm2, %v1374_v6, %v1376_v48  ;;  %v2366_v6 = vld [vmem:[#allocation2] sm:$0xff] }
 0xf3d   :  { %v1379_v51 = vmul.f32 %v1377_v49, %v1363_v24 }
 0xf3f   :  { %1381 = vrot.lane.b32.xlu0 %v1379_v51, %s2418_s26 }
 0xf8c   :  { %v843_v55 = vpop.permute.xlu0 %842 }
 0xf8d   :  { %v845_v57 = vmul.f32 %v843_v55, %v838_v56 }
 0xf8f   :  { %847 = vrot.lane.b32.xlu0 %v845_v57, %s2423_s28 }
 0xfb1   :  { %v1382_v3 = vpop.permute.xlu0 %1381 }
 0xfb2   :  { %v2956_v12 = vadd.f32 %v1382_v3, %v1370_v53 }
 0xfb4   :  { %2290 = vtanh.f32 %v2956_v12 }
 0xfc1   :  { %v2291_v15 = vpop.eup %2290 }
 0xfc2   :  { %1387 = vrot.lane.b32.xlu1 %v2291_v15, %s2419_s27 }
 0xfe6   :  { %94 = vadd.xlane.f32.xlu1 %v93_v21 }
0x1001   :  { %v848_v13 = vpop.permute.xlu0 %847 }
0x1002   :  { %v2960_v14 = vadd.f32 %v848_v13, %v840_v8 }
0x1004   :  { %2292 = vtanh.f32 %v2960_v14 }
0x1005   :  { %2294 = vtanh.f32 %v1366_v18 }
0x1011   :  { %v2293_v17 = vpop.eup %2292 }
0x1012   :  { %853 = vrot.lane.b32.xlu0 %v2293_v17, %s2424_s29  ;;  %v2295_v20 = vpop.eup %2294 }
0x1013   :  { %v1368_v16 = vadd.f32 1.0, %v2295_v20 }
0x1015   :  { %v1369_v22 = vmul.f32 0.5, %v1368_v16 }
0x1034   :  { %v1388_v58 = vpop.permute.xlu1 %1387 }
0x1035   :  { %v1390_v59 = vmul.f32 %v1388_v58, %v1369_v22 }
0x1037   :  { %1393 = vrot.lane.b32.xlu0 %v1390_v59, %s2421_s16 }
0x106f   :  { %v95_v57 = vpop.xlane.xlu1 %94 }
0x1070   :  { %v109_v3 = vadd.f32 %v2539_v25, %v95_v57 }
0x1084   :  { %v854_v60 = vpop.permute.xlu0 %853 }
0x1085   :  { %v856_v61 = vmul.f32 %v854_v60, %v838_v56 }
0x1087   :  { %860 = vperm.xlu0 %2213, %v856_v61  }
0x108b   :  { %2214 = vset.pattern.permute.xlu0 %v2416_v23 }
0x10a9   :  { %v1394_v63 = vpop.permute.xlu0 %1393 }
0x10aa   :  { %2154 = vmatmul.mubr.msk.f32.vlgmr.msra.gmra.mxu1 %vm209_vm4, %v1394_v63  ;;  %1982 = vmatmul.mubr.msk.f32.vlgmr.msra.gmra.mxu0 %vm209_vm4, %v1394_v63 }
0x10ab   :  { %2157 = vmatpush3.msk.msra.mxu1 %vm213_vm0, %v2976_v2  ;;  %1986 = vmatpush1.msk.msra.mxu0 %vm213_vm0, %v2351_v42 }
0x10ac   :  { %2158 = vmatprep.subr.mxu1 %v2415_v1  ;;  %1729 = vmatprep.subr.mxu0 %v2899_v27  ;;  %v2354_v27 = vld [vmem:[#allocation2 + $0x40] sm:$0xff] }
0x10ad   :  { %2159 = vmatpush3.msra.mxu1 %v2986_v36  ;;  %1730 = vmatpush1.msra.mxu0 %v2903_v28  ;;  %v3002_v28 = vld [vmem:[%s3159_s2 + $0x18] sm:$0xff] }
0x10ae   :  { %2160 = vmatprep.subr.mxu1 %v2415_v1  ;;  %1731 = vmatprep.subr.mxu0 %v2907_v35  ;;  %v2357_v35 = vld [vmem:[#allocation2 + $0x30] sm:$0xff] }
0x10af   :  { %2161 = vmatpush3.msra.mxu1 %v2995_v37  ;;  %1732 = vmatpush1.msra.mxu0 %v2354_v27 }
0x10b0   :  { %2162 = vmatprep.subr.mxu1 %v2415_v1  ;;  %1733 = vmatprep.subr.mxu0 %v2355_v29 }
0x10b1   :  { %2163 = vmatpush3.msra.mxu1 %v3002_v28  ;;  %1734 = vmatpush1.msra.mxu0 %v2357_v35 }
0x10b2   :  { %2164 = vmatprep.subr.mxu1 %v2415_v1  ;;  %1735 = vmatprep.subr.mxu0 %v2358_v9 }
0x10b3   :  { %2165 = vmatpush3.msra.mxu1 %v3009_v10  ;;  %1736 = vmatpush1.msra.mxu0 %v2360_v39 }
0x10b4   :  { %2166 = vmatprep.subr.mxu1 %v2415_v1  ;;  %1737 = vmatprep.subr.mxu0 %v2361_v40 }
0x10b5   :  { %2167 = vmatpush3.msra.mxu1 %v3016_v41  ;;  %1738 = vmatpush1.msra.mxu0 %v2363_v43 }
0x10b6   :  { %2168 = vmatprep.subr.mxu1 %v2415_v1  ;;  %1739 = vmatprep.subr.mxu0 %v2364_v44 }
0x10b7   :  { %2169 = vmatpush3.msra.mxu1 %v3023_v47  ;;  %2170 = vmatprep.mubr.msk.f32.mxu1 %vm2420_vm3, %v2415_v1 }
0x10b8   :  { %1740 = vmatpush1.msra.mxu0 %v2366_v6  ;;  %1773 = vmatprep.mubr.f32.mxu0 %v2415_v1 }
0x10b9   :  { %2173 = vmatprep.subr.mxu1 %v2415_v1 }
0x1102   :  { %v861_v45 = vpop.permute.xlu0 %860 }
0x1103   :  { %v969_v24 = vmul.f32 %v861_v45, %v2810_v5 }
0x1105   :  { %v1042_v48 = vadd.f32 %v2864_v46, %v969_v24  ;;  %v117_v46 = vmax.f32 %v109_v3, 0.0  ;;  %v3053_v24 = vand.u32 127, %v62_v0 }
0x1107   :  { %v1045_v49 = vadd.f32 %v1042_v48, %v2816_v26  ;;  %vm646_vm5 = vcmp.eq.s32.totalorder %v3053_v24, 1  ;;  %vm435_vm6 = vcmp.eq.s32.totalorder %v3053_v24, 0  ;;  %vm857_vm7 = vcmp.eq.s32.totalorder %v3053_v24, 2 }
0x1108   :  { %v652_v48 = vsel %vm646_vm5, %v2945_v11, 0.0  ;;  %vm1068_vm8 = vcmp.eq.s32.totalorder %v3053_v24, 3  ;;  %vm1279_vm9 = vcmp.eq.s32.totalorder %v3053_v24, 4  ;;  %vm1490_vm10 = vcmp.eq.s32.totalorder %v3053_v24, 5 }
0x1109   :  { %2296 = vtanh.f32 %v1045_v49  ;;  %v1046_v52 = vmul.f32 0.5, %v1045_v49  ;;  %v441_v49 = vsel %vm435_vm6, %v2877_v38, 0.0  ;;  %vm1701_vm11 = vcmp.eq.s32.totalorder %v3053_v24, 6 }
0x110a   :  { %vm1912_vm12 = vcmp.eq.s32.totalorder %v3053_v24, 7 }
0x110b   :  { %2298 = vtanh.f32 %v1046_v52 }
0x1116   :  { %v2297_v51 = vpop.eup %2296 }
0x1117   :  { %1053 = vrot.lane.b32.xlu0 %v2297_v51, %s2422_s1  ;;  %v863_v51 = vsel %vm857_vm7, %v861_v45, 0.0 }
0x1118   :  { %v2299_v56 = vpop.eup %2298 }
0x1119   :  { %v1048_v55 = vadd.f32 1.0, %v2299_v56 }
0x111b   :  { %v1049_v53 = vmul.f32 0.5, %v1048_v55 }
0x111d   :  { %v1051_v13 = vmul.f32 %v1049_v53, %v2960_v14 }
0x116a   :  { %v3034_v50 = vpop.f32.mrf.mxu1  ;;  %v1564_v21 = vpop.f32.mrf.mxu0 }
0x116c   :  { %v2155_v4 = vpop.f32.mrf.mxu1  ;;  %v1566_v14 = vpop.f32.mrf.mxu0 }
0x116d   :  { %v653_v4 = vadd.f32 %v652_v48, %v441_v49 }
0x116f   :  { %v864_v52 = vadd.f32 %v863_v51, %v653_v4 }
0x1189   :  { %v1054_v15 = vpop.permute.xlu0 %1053 }
0x118a   :  { %v1056_v8 = vmul.f32 %v1054_v15, %v1049_v53 }
0x118c   :  { %1058 = vrot.lane.b32.xlu0 %v1056_v8, %s2423_s28 }
0x1190   :  { %151 = vperm.xlu0 %2214, %v117_v46  }
0x1194   :  { %2215 = vset.pattern.permute.xlu0 %v2425_v54 }
0x11fe   :  { %v1059_v17 = vpop.permute.xlu0 %1058 }
0x11ff   :  { %v3040_v18 = vadd.f32 %v1059_v17, %v1051_v13 }
0x1201   :  { %2300 = vtanh.f32 %v3040_v18 }
0x120b   :  { %v152_v30 = vpop.permute.xlu0 %151 }
0x120c   :  { %v179_v19 = vmul.f32 %v2550_v31, %v152_v30  ;;  %v180_v20 = vmul.f32 %v2554_v32, %v152_v30 }
0x120e   :  { %v2301_v16 = vpop.eup %2300  ;;  %v203_v22 = vadd.f32 %v2558_v33, %v179_v19  ;;  %v204_v58 = vadd.f32 %v2562_v34, %v180_v20 }
0x120f   :  { %1064 = vrot.lane.b32.xlu0 %v2301_v16, %s2424_s29 }
0x1210   :  { %v1569_v59 = vadd.f32 %v1564_v21, %v203_v22  ;;  %v1570_v60 = vadd.f32 %v1566_v14, %v204_v58 }
0x1212   :  { %2302 = vtanh.f32 %v1569_v59  ;;  %v1571_v42 = vmul.f32 0.5, %v1569_v59  ;;  %v1577_v13 = vmul.f32 0.5, %v1570_v60 }
0x1213   :  { %2304 = vtanh.f32 %v1570_v60 }
0x1214   :  { %2306 = vtanh.f32 %v1571_v42 }
0x121f   :  { %v2303_v61 = vpop.eup %2302 }
0x1220   :  { %1584 = vrot.lane.b32.xlu0 %v2303_v61, %s2417_s25  ;;  %v2305_v63 = vpop.eup %2304 }
0x1221   :  { %v2307_v35 = vpop.eup %2306 }
0x1222   :  { %v1573_v39 = vadd.f32 1.0, %v2307_v35 }
0x1224   :  { %1586 = vrot.lane.b32.xlu0 %v2305_v63, %s2417_s25  ;;  %v1574_v40 = vmul.f32 0.5, %v1573_v39 }
0x1226   :  { %v1581_v11 = vmul.f32 %v1574_v40, %v2956_v12 }
0x1281   :  { %v1065_v27 = vpop.permute.xlu0 %1064 }
0x1282   :  { %v1067_v29 = vmul.f32 %v1065_v27, %v1049_v53 }
0x1284   :  { %1071 = vperm.xlu0 %2215, %v1067_v29  }
0x1292   :  { %v1585_v9 = vpop.permute.xlu0 %1584 }
0x1296   :  { %v1587_v43 = vpop.permute.xlu0 %1586 }
0x1297   :  { %v1588_v44 = vsel %vm310_vm2, %v1585_v9, %v1587_v43 }
0x1298   :  { %v1590_v6 = vmul.f32 %v1588_v44, %v1574_v40 }
0x129a   :  { %1592 = vrot.lane.b32.xlu0 %v1590_v6, %s2418_s26 }
0x12ff   :  { %v1072_v56 = vpop.permute.xlu0 %1071 }
0x1300   :  { %v1074_v55 = vsel %vm1068_vm8, %v1072_v56, 0.0  ;;  %v1180_v0 = vmul.f32 %v1072_v56, %v2810_v5 }
0x1301   :  { %v3062_v57 = vadd.f32 %v1074_v55, %v864_v52 }
0x1302   :  { %v1253_v53 = vadd.f32 %v2940_v62, %v1180_v0 }
0x1304   :  { %v1256_v3 = vadd.f32 %v1253_v53, %v2816_v26 }
0x1306   :  { %2308 = vtanh.f32 %v1256_v3  ;;  %v1257_v46 = vmul.f32 0.5, %v1256_v3 }
0x130c   :  { %v1593_v15 = vpop.permute.xlu0 %1592 }
0x130d   :  { %v3067_v38 = vadd.f32 %v1593_v15, %v1581_v11 }
0x130f   :  { %2310 = vtanh.f32 %v3067_v38 }
0x1310   :  { %2312 = vtanh.f32 %v1257_v46 }
0x1311   :  { %2314 = vtanh.f32 %v1577_v13 }
0x1313   :  { %v2309_v45 = vpop.eup %2308 }
0x1314   :  { %1264 = vrot.lane.b32.xlu1 %v2309_v45, %s2422_s1 }
0x131c   :  { %v2311_v8 = vpop.eup %2310 }
0x131d   :  { %1598 = vrot.lane.b32.xlu0 %v2311_v8, %s2419_s27  ;;  %v2313_v62 = vpop.eup %2312 }
0x131e   :  { %v1259_v17 = vadd.f32 1.0, %v2313_v62  ;;  %v2315_v12 = vpop.eup %2314 }
0x131f   :  { %v1579_v21 = vadd.f32 1.0, %v2315_v12 }
0x1320   :  { %v1260_v30 = vmul.f32 0.5, %v1259_v17 }
0x1321   :  { %v1580_v16 = vmul.f32 0.5, %v1579_v21 }
0x1322   :  { %v1262_v59 = vmul.f32 %v1260_v30, %v3040_v18 }
0x1386   :  { %v1265_v19 = vpop.permute.xlu1 %1264 }
0x1387   :  { %v1267_v20 = vmul.f32 %v1265_v19, %v1260_v30 }
0x1389   :  { %1269 = vrot.lane.b32.xlu0 %v1267_v20, %s2423_s28 }
0x138f   :  { %v1599_v22 = vpop.permute.xlu0 %1598 }
0x1390   :  { %v1601_v58 = vmul.f32 %v1599_v22, %v1580_v16 }
0x1392   :  { %1604 = vrot.lane.b32.xlu0 %v1601_v58, %s2421_s16 }
0x13fb   :  { %v1270_v14 = vpop.permute.xlu0 %1269 }
0x13fc   :  { %v3075_v61 = vadd.f32 %v1270_v14, %v1262_v59 }
0x13fe   :  { %2316 = vtanh.f32 %v3075_v61 }
0x1404   :  { %v1605_v60 = vpop.permute.xlu0 %1604 }
0x1405   :  { %2171 = vmatmul.mubr.msk.f32.vlgmr.msra.gmra.mxu1 %vm209_vm4, %v1605_v60  ;;  %1987 = vmatmul.mubr.msk.f32.vlgmr.msra.gmra.mxu0 %vm209_vm4, %v1605_v60 }
0x1406   :  { %2174 = vmatpush3.msk.msra.mxu1 %vm213_vm0, %v2976_v2  ;;  %2187 = vmatprep.mubr.msk.f32.mxu1 %vm2420_vm3, %v2415_v1  ;;  %v61_v2 = vld [vmem:[%s3157_s0 + $0xe] sm:$0x3] }
0x1407   :  { %2175 = vmatprep.subr.mxu1 %v2415_v1 }
0x1408   :  { %2176 = vmatpush3.msra.mxu1 %v2986_v36  ;;  %v73_v36 = vmul.f32 %v2470_v7, %v61_v2 }
0x1409   :  { %2177 = vmatprep.subr.mxu1 %v2415_v1 }
0x140a   :  { %2178 = vmatpush3.msra.mxu1 %v2995_v37  ;;  %v96_v37 = vsel %vm74_vm1, %v73_v36, 0.0 }
0x140b   :  { %v2317_v18 = vpop.eup %2316  ;;  %2179 = vmatprep.subr.mxu1 %v2415_v1 }
0x140c   :  { %1275 = vrot.lane.b32.xlu0 %v2317_v18, %s2424_s29  ;;  %2180 = vmatpush3.msra.mxu1 %v3002_v28 }
0x140d   :  { %2181 = vmatprep.subr.mxu1 %v2415_v1 }
0x140e   :  { %2182 = vmatpush3.msra.mxu1 %v3009_v10 }
0x140f   :  { %2183 = vmatprep.subr.mxu1 %v2415_v1 }
0x1410   :  { %2184 = vmatpush3.msra.mxu1 %v3016_v41 }
0x1411   :  { %2185 = vmatprep.subr.mxu1 %v2415_v1 }
0x1412   :  { %2186 = vmatpush3.msra.mxu1 %v3023_v47 }
0x142b   :  { %97 = vadd.xlane.f32.xlu0 %v96_v37 }
0x147e   :  { %v1276_v28 = vpop.permute.xlu0 %1275 }
0x147f   :  { %v1278_v63 = vmul.f32 %v1276_v28, %v1260_v30 }
0x1481   :  { %1282 = vperm.xlu1 %2212, %v1278_v63  }
0x1485   :  { %2216 = vset.pattern.permute.xlu1 %v2416_v23 }
0x14b4   :  { %v98_v27 = vpop.xlane.xlu0 %97 }
0x14b5   :  { %v110_v29 = vadd.f32 %v2539_v25, %v98_v27 }
0x14b7   :  { %v118_v9 = vmax.f32 %v110_v29, 0.0 }
0x14c5   :  { %v3103_v10 = vpop.f32.mrf.mxu1  ;;  %v1775_v49 = vpop.f32.mrf.mxu0 }
0x14c7   :  { %v2172_v41 = vpop.f32.mrf.mxu1  ;;  %v1777_v52 = vpop.f32.mrf.mxu0 }
0x14fc   :  { %v3105_v1 = vpop.permute.xlu1 %1282 }
0x14fd   :  { %v1391_v47 = vmul.f32 %v3105_v1, %v2810_v5 }
0x14ff   :  { %v1464_v42 = vadd.f32 %v3034_v50, %v1391_v47 }
0x1501   :  { %v1467_v7 = vadd.f32 %v1464_v42, %v2816_v26 }
0x1503   :  { %2318 = vtanh.f32 %v1467_v7  ;;  %v1468_v23 = vmul.f32 0.5, %v1467_v7 }
0x1505   :  { %2320 = vtanh.f32 %v1468_v23 }
0x1510   :  { %v2319_v35 = vpop.eup %2318 }
0x1511   :  { %1475 = vrot.lane.b32.xlu1 %v2319_v35, %s2422_s1 }
0x1512   :  { %v2321_v39 = vpop.eup %2320 }
0x1513   :  { %v1470_v40 = vadd.f32 1.0, %v2321_v39 }
0x1515   :  { %156 = vperm.xlu1 %2216, %v118_v9   ;;  %v1471_v43 = vmul.f32 0.5, %v1470_v40 }
0x1519   :  { %2217 = vset.pattern.permute.xlu1 %v2425_v54 }
0x1583   :  { %v1476_v44 = vpop.permute.xlu1 %1475 }
0x1584   :  { %v1478_v50 = vmul.f32 %v1476_v44, %v1471_v43 }
0x1586   :  { %1480 = vrot.lane.b32.xlu1 %v1478_v50, %s2423_s28 }
0x1590   :  { %v157_v6 = vpop.permute.xlu1 %156 }
0x1591   :  { %v181_v48 = vmul.f32 %v2550_v31, %v157_v6  ;;  %v182_v25 = vmul.f32 %v2554_v32, %v157_v6  ;;  %v1473_v31 = vmul.f32 %v1471_v43, %v3075_v61 }
0x1593   :  { %v205_v51 = vadd.f32 %v2558_v33, %v181_v48  ;;  %v206_v4 = vadd.f32 %v2562_v34, %v182_v25 }
0x1595   :  { %v1780_v54 = vadd.f32 %v1775_v49, %v205_v51  ;;  %v1781_v56 = vadd.f32 %v1777_v52, %v206_v4 }
0x1597   :  { %2322 = vtanh.f32 %v1780_v54  ;;  %v1782_v3 = vmul.f32 0.5, %v1780_v54  ;;  %v1788_v22 = vmul.f32 0.5, %v1781_v56 }
0x1598   :  { %2324 = vtanh.f32 %v1781_v56 }
0x15a4   :  { %v2323_v55 = vpop.eup %2322 }
0x15a5   :  { %1795 = vrot.lane.b32.xlu1 %v2323_v55, %s2417_s25  ;;  %v2325_v0 = vpop.eup %2324 }
0x15a9   :  { %1797 = vrot.lane.b32.xlu1 %v2325_v0, %s2417_s25 }
0x15f8   :  { %v1481_v53 = vpop.permute.xlu1 %1480 }
0x15f9   :  { %v1483_v32 = vadd.f32 %v1481_v53, %v1473_v31 }
0x15fb   :  { %2326 = vtanh.f32 %v1483_v32 }
0x15fc   :  { %2328 = vtanh.f32 %v1782_v3 }
0x1608   :  { %v2327_v33 = vpop.eup %2326 }
0x1609   :  { %1486 = vrot.lane.b32.xlu1 %v2327_v33, %s2424_s29  ;;  %v2329_v34 = vpop.eup %2328  ;;  %v1285_v33 = vsel %vm1279_vm9, %v3105_v1, 0.0 }
0x160a   :  { %v1784_v15 = vadd.f32 1.0, %v2329_v34 }
0x160c   :  { %v1785_v45 = vmul.f32 0.5, %v1784_v15 }
0x160e   :  { %v1792_v30 = vmul.f32 %v1785_v45, %v3067_v38 }
0x1617   :  { %v1796_v11 = vpop.permute.xlu1 %1795 }
0x161b   :  { %v1798_v8 = vpop.permute.xlu1 %1797 }
0x161c   :  { %v1799_v46 = vsel %vm310_vm2, %v1796_v11, %v1798_v8  ;;  %v1286_v11 = vadd.f32 %v1285_v33, %v3062_v57 }
0x161d   :  { %v1801_v13 = vmul.f32 %v1799_v46, %v1785_v45 }
0x161f   :  { %1803 = vrot.lane.b32.xlu1 %v1801_v13, %s2418_s26  ;;  %s2426_s26 = smov 127  }
0x167b   :  { %v1487_v62 = vpop.permute.xlu1 %1486 }
0x167c   :  { %v1489_v17 = vmul.f32 %v1487_v62, %v1471_v43 }
0x167e   :  { %1493 = vperm.xlu1 %2217, %v1489_v17  }
0x1691   :  { %v1804_v19 = vpop.permute.xlu1 %1803 }
0x1692   :  { %v1806_v12 = vadd.f32 %v1804_v19, %v1792_v30 }
0x1694   :  { %2330 = vtanh.f32 %v1806_v12 }
0x1695   :  { %2332 = vtanh.f32 %v1788_v22 }
0x16a1   :  { %v2331_v20 = vpop.eup %2330 }
0x16a2   :  { %1809 = vrot.lane.b32.xlu0 %v2331_v20, %s2419_s27  ;;  %v2333_v14 = vpop.eup %2332 }
0x16a3   :  { %v1790_v61 = vadd.f32 1.0, %v2333_v14 }
0x16a5   :  { %v1791_v60 = vmul.f32 0.5, %v1790_v61 }
0x16f9   :  { %v3127_v21 = vpop.permute.xlu1 %1493 }
0x16fa   :  { %v1602_v16 = vmul.f32 %v3127_v21, %v2810_v5  ;;  %v1496_v34 = vsel %vm1490_vm10, %v3127_v21, 0.0 }
0x16fb   :  { %v1497_v45 = vadd.f32 %v1496_v34, %v1286_v11 }
0x16fc   :  { %v1675_v58 = vadd.f32 %v3103_v10, %v1602_v16 }
0x16fe   :  { %v1678_v59 = vadd.f32 %v1675_v58, %v2816_v26 }
0x1700   :  { %2334 = vtanh.f32 %v1678_v59  ;;  %v1679_v36 = vmul.f32 0.5, %v1678_v59 }
0x1702   :  { %2336 = vtanh.f32 %v1679_v36 }
0x170d   :  { %v2335_v38 = vpop.eup %2334 }
0x170e   :  { %1686 = vrot.lane.b32.xlu1 %v2335_v38, %s2422_s1 }
0x170f   :  { %v2337_v37 = vpop.eup %2336 }
0x1710   :  { %v1681_v28 = vadd.f32 1.0, %v2337_v37 }
0x1712   :  { %v1682_v63 = vmul.f32 0.5, %v1681_v28 }
0x1714   :  { %v1810_v18 = vpop.permute.xlu0 %1809  ;;  %v1684_v42 = vmul.f32 %v1682_v63, %v1483_v32 }
0x1715   :  { %v1812_v2 = vmul.f32 %v1810_v18, %v1791_v60 }
0x1717   :  { %1815 = vrot.lane.b32.xlu1 %v1812_v2, %s2421_s16  ;;  %s2427_s16 = smov [#allocation5]  }
0x1718   :  { %s1942_s24 = sshll.u32 %s2427_s16, 4  ;;  %s1943_s24 = int_to_ptr.vmem [resolvable:$true] %s1942_s24 }
0x1719   :  { %p2393_p6 = scmp.lt.s32.totalorder %s1943_s24, %s1943_s24 }
0x1780   :  { %v1687_v10 = vpop.permute.xlu1 %1686 }
0x1781   :  { %v1689_v41 = vmul.f32 %v1687_v10, %v1682_v63 }
0x1783   :  { %1691 = vrot.lane.b32.xlu1 %v1689_v41, %s2423_s28 }
0x1789   :  { %v1816_v47 = vpop.permute.xlu1 %1815 }
0x178a   :  { %2188 = vmatmul.mubr.msk.f32.vlgmr.msra.gmra.mxu1 %vm209_vm4, %v1816_v47 }
0x17f5   :  { %v1692_v7 = vpop.permute.xlu1 %1691 }
0x17f6   :  { %v1694_v27 = vadd.f32 %v1692_v7, %v1684_v42 }
0x17f8   :  { %2338 = vtanh.f32 %v1694_v27 }
0x1805   :  { %v2339_v29 = vpop.eup %2338 }
0x1806   :  { %1697 = vrot.lane.b32.xlu1 %v2339_v29, %s2424_s29 }
0x184a   :  { %v1885_v35 = vpop.f32.mrf.mxu1 }
0x184c   :  { %v2189_v9 = vpop.f32.mrf.mxu1 }
0x1878   :  { %v1698_v23 = vpop.permute.xlu1 %1697 }
0x1879   :  { %v1700_v39 = vmul.f32 %v1698_v23, %v1682_v63 }
0x187b   :  { %1704 = vperm.xlu1 %2217, %v1700_v39  }
0x18f6   :  { %v1705_v40 = vpop.permute.xlu1 %1704 }
0x18f7   :  { %v1813_v43 = vmul.f32 %v1705_v40, %v2810_v5  ;;  %v2367_v5 = vld [vmem:[%s3160_s3] sm:$0x3]  ;;  %v1707_v15 = vsel %vm1701_vm11, %v1705_v40, 0.0 }
0x18f8   :  { %v1921_v52 = vrot.slane %v2367_v5, 1  ;;  %v1708_v8 = vadd.f32 %v1707_v15, %v1497_v45 }
0x18f9   :  { %v1886_v44 = vadd.f32 %v1885_v35, %v1813_v43 }
0x18fb   :  { %v1889_v50 = vadd.f32 %v1886_v44, %v2816_v26 }
0x18fd   :  { %2340 = vtanh.f32 %v1889_v50  ;;  %v1890_v48 = vmul.f32 0.5, %v1889_v50 }
0x18ff   :  { %2342 = vtanh.f32 %v1890_v48 }
0x190a   :  { %v2341_v6 = vpop.eup %2340 }
0x190b   :  { %1897 = vrot.lane.b32.xlu0 %v2341_v6, %s2422_s1 }
0x190c   :  { %v2343_v25 = vpop.eup %2342 }
0x190d   :  { %v1892_v49 = vadd.f32 1.0, %v2343_v25 }
0x190f   :  { %v1893_v51 = vmul.f32 0.5, %v1892_v49 }
0x1911   :  { %v1895_v26 = vmul.f32 %v1893_v51, %v1694_v27 }
0x197d   :  { %v1898_v4 = vpop.permute.xlu0 %1897 }
0x197e   :  { %v1900_v54 = vmul.f32 %v1898_v4, %v1893_v51 }
0x1980   :  { %1902 = vrot.lane.b32.xlu1 %v1900_v54, %s2423_s28 }
0x1984   :  { %1922 = vrot.lane.b32.xlu1 %v1921_v52, %s2426_s26 }
0x19f2   :  { %v1903_v56 = vpop.permute.xlu1 %1902 }
0x19f3   :  { %v1905_v55 = vadd.f32 %v1903_v56, %v1895_v26 }
0x19f5   :  { %2344 = vtanh.f32 %v1905_v55 }
0x19f6   :  { %v1923_v0 = vpop.permute.xlu1 %1922 }
0x19f7   :  { %2190 = vpush %v1923_v0 }
0x1a02   :  { %v2345_v31 = vpop.eup %2344 }
0x1a03   :  { %1908 = vrot.lane.b32.xlu0 %v2345_v31, %s2424_s29 }
0x1a07   :  { %1928 = vrot.lane.b32.xlu0 %v1921_v52, %s2422_s1  ;;  %s2388_s1 = scalar_lea.vmem %s1943_s24, 32 }
0x1a08   :  { %p2389_p5 = scmp.ne.s32.totalorder %s1943_s24, %s2388_s1  ;;  %p2394_p7 = scmp.lt.s32.totalorder %s2388_s1, %s2388_s1 }
0x1a0a   :  { %p2395_p8 = por %p2394_p7, %p2393_p6 }
0x1a0c   :  { %p2396_p9 = pnand %p2395_p8, %p2389_p5 }
0x1a28   :  { %s2191_s3 = spop %2190 }
0x1a29   :  { %v1925_v62 = vstv %s2191_s3 }
0x1a75   :  { %v1909_v53 = vpop.permute.xlu0 %1908 }
0x1a76   :  { %v1911_v32 = vmul.f32 %v1909_v53, %v1893_v51 }
0x1a78   :  { %1915 = vperm.xlu1 %2217, %v1911_v32  }
0x1a79   :  { %v1929_v3 = vpop.permute.xlu0 %1928 }
0x1a7a   :  { %2192 = vpush %v1929_v3 }
0x1aab   :  { %s2193_s27 = spop %2192 }
0x1aac   :  { %v1931_v30 = vstv %s2193_s27 }
0x1af3   :  { %v1916_v46 = vpop.permute.xlu1 %1915 }
0x1af4   :  { %v1918_v13 = vsel %vm1912_vm12, %v1916_v46, 0.0 }
0x1af5   :  { %v1919_v17 = vadd.f32 %v1918_v13, %v1708_v8 }
0x1af7   :  { %v1927_v1 = vmul.f32 %v1925_v62, %v1919_v17 }
0x1af9   :  { %v1933_v19 = vadd.f32 %v1931_v30, %v1927_v1 }
0x1afb   :  { %1935 = vst.msk [vmem:[#allocation5] sm:$0x3] %vm1934_vm13, %v1933_v19 }
0x1afc   :  { %2399 = shalt.err (!%p2396_p9)
}
0x1afd   :  { %1945 = dma.vmem_to_hbm [thread:$0]  %s1943_s24, 32, %s3161_s4, [#allocation4]  }
0x1afe   :  { %2410 = dma.done.wait [#allocation4], 32  }
0x1aff   :  { %2411 = vsyncadd [#allocation4], 4294967264 }
0x1b00   :  { %1949 = vsyncpa [#allocation3], 1 }
0x1b01   :  { %1950 = vsyncpa [#allocation4], 1 }

</bundles_post_ra>
